<compile_context>
chip_gen: v5e
topology: v5e:2x2
jax: 0.10.0
libtpu: 0.0.40
codegen_flags: <defaults>
</compile_context>

<pallas_src>
import functools

import jax
import jax.numpy as jnp
from jax import lax
from jax.experimental import pallas as pl
from jax.experimental.pallas import tpu as pltpu

EPS = 1e-5                             # nn.InstanceNorm2d default (affine=False)
_STK_TARGET_BYTES = 2 * 1024 * 1024    # cap for the K-stacked (9C, TJ) bf16 operand


# ---------------------------------------------------------------------------
# Fused kernel
# ---------------------------------------------------------------------------
def _resnet_block_kernel(xp_ref, w1_ref, w2_ref, o_ref, pad_ref,
                         *, H, W, Wp, row_tile):
    """Fused ReflPad->Conv3x3->IN->ReLU->ReflPad->Conv3x3->IN->(+x).

    xp_ref : (1, C, Hp*Wp+2) reflection-padded, row-stride-Wp flattened x
    w1_ref : (C, 9C) conv1 weights, tap-major along K (bf16)
    w2_ref : (C, 9C) conv2 weights (bf16)
    o_ref  : (1, C, H*Wp) output in "garbage-laned" layout: columns j with
             (j % Wp) >= W are don't-care and sliced away by the wrapper.
    pad_ref: VMEM (C, Hp*Wp+2) bf16 scratch holding the padded activation of
             whichever stage is currently being convolved.
    """
    C = w1_ref.shape[0]
    J = H * Wp
    inv_n = 1.0 / float(H * W)

    # Stage 0: bf16 working copy of the padded input (MXU operand precision).
    pad_ref[...] = xp_ref[0].astype(jnp.bfloat16)

    masks = {}

    def valid_mask(tj):
        # (1, tj) mask of columns mapping to real pixels (col % Wp < W).
        if tj not in masks:
            colq = lax.broadcasted_iota(jnp.int32, (1, tj), 1) % Wp
            masks[tj] = colq < W
        return masks[tj]

    def conv_in(w_ref):
        """3x3 conv over pad_ref via K-stacked matmuls + InstanceNorm stats.

        Returns (h, mean, rstd): h is the (C, J) f32 pre-norm conv output in
        garbage-laned layout; mean / rstd are per-channel (C, 1) f32.
        """
        w = w_ref[...]                                    # (C, 9C) bf16
        s1 = jnp.zeros((C, 1), jnp.float32)
        s2 = jnp.zeros((C, 1), jnp.float32)
        tiles = []
        for t0 in range(0, H, row_tile):
            th = min(row_tile, H - t0)
            tj = th * Wp
            base = t0 * Wp
            # Stack the 9 shifted tap slices along K:
            #   stk[k*C + c, q] = pad[c, base + q + kh*Wp + kw],  k = kh*3 + kw
            stk = jnp.concatenate(
                [pad_ref[:, base + (k // 3) * Wp + (k % 3):
                            base + (k // 3) * Wp + (k % 3) + tj]
                 for k in range(9)], axis=0)              # (9C, tj) bf16
            acc = jnp.dot(w, stk, preferred_element_type=jnp.float32)  # (C, tj)
            tiles.append(acc)
            accm = jnp.where(valid_mask(tj), acc, 0.0)    # mask once
            s1 = s1 + jnp.sum(accm, axis=1, keepdims=True)
            s2 = s2 + jnp.sum(accm * accm, axis=1, keepdims=True)
        h = tiles[0] if len(tiles) == 1 else jnp.concatenate(tiles, axis=1)
        mean = s1 * inv_n
        var = jnp.maximum(s2 * inv_n - mean * mean, 0.0)  # biased var (torch IN)
        return h, mean, lax.rsqrt(var + EPS)

    # ---- stage 1: conv1 + InstanceNorm + ReLU -------------------------------
    h1, mean1, rstd1 = conv_in(w1_ref)
    y = jnp.maximum((h1 - mean1) * rstd1, 0.0).astype(jnp.bfloat16)   # (C, J)

    # In-VMEM reflection padding of the intermediate.  Horizontally padded
    # rows h_hpad[i*Wp + jp]:
    #   jp == 0      -> y[i, 1]     (= y[m+1])
    #   1 <= jp <= W -> y[i, jp-1]  (= y[m-1])
    #   jp == Wp-1   -> y[i, W-2]   (= y[m-3])
    # Only valid columns of y are ever selected, so its garbage lanes never
    # leak.  Explicit shifted concats: no reliance on roll sign conventions.
    col = lax.broadcasted_iota(jnp.int32, (1, J), 1) % Wp
    sh_p1 = jnp.concatenate([y[:, 1:], y[:, J - 1:]], axis=1)    # m -> y[m+1]
    sh_m1 = jnp.concatenate([y[:, :1], y[:, :J - 1]], axis=1)    # m -> y[m-1]
    sh_m3 = jnp.concatenate([y[:, :3], y[:, :J - 3]], axis=1)    # m -> y[m-3]
    h_hpad = jnp.where(col == 0, sh_p1,
                       jnp.where(col == Wp - 1, sh_m3, sh_m1))   # (C, J) bf16
    # Full padded buffer = [top row | interior rows | bottom row | 2 tail cols]
    # Top row mirrors image row 1, bottom row mirrors image row H-2; the tail
    # columns are don't-care (only ever read into garbage output columns).
    pad_ref[...] = jnp.concatenate(
        [h_hpad[:, Wp:2 * Wp], h_hpad,
         h_hpad[:, (H - 2) * Wp:(H - 1) * Wp], h_hpad[:, :2]], axis=1)

    # ---- stage 2: conv2 + InstanceNorm + residual add -----------------------
    h2, mean2, rstd2 = conv_in(w2_ref)
    res = xp_ref[0, :, Wp + 1:Wp + 1 + J].astype(jnp.float32)    # x, full precision
    o_ref[0] = (res + (h2 - mean2) * rstd2).astype(o_ref.dtype)


# ---------------------------------------------------------------------------
# JAX glue (one cheap pad pass on the input, one slice on the output)
# ---------------------------------------------------------------------------
def _weights_flat(w):
    # (C_out, C_in, 3, 3) -> (C_out, 9*C_in), K ordered tap-major:
    # column (kh*3 + kw)*C_in + c_in  <->  w[c_out, c_in, kh, kw]
    C_out, C_in = w.shape[0], w.shape[1]
    return jnp.transpose(w, (0, 2, 3, 1)).reshape(C_out, 9 * C_in)


def _reflect_pad_flat(z, Wp):
    # (N, C, H, W) -> (N, C, Hp*Wp + 2): reflection pad, flatten rows with
    # stride Wp, +2 tail columns so every tap slice of length H*Wp is in bounds.
    N, C, H, W = z.shape
    zp = jnp.pad(z, ((0, 0), (0, 0), (1, 1), (1, 1)), mode="reflect")
    zf = zp.reshape(N, C, (H + 2) * Wp)
    return jnp.pad(zf, ((0, 0), (0, 0), (0, 2)))


def resnet_block(x, w1, b1, w2, b2):
    # b1/b2 accepted for API parity but unused: a per-channel bias added right
    # before InstanceNorm cancels exactly in the mean subtraction.
    del b1, b2
    N, C, H, W = x.shape
    Hp, Wp = H + 2, W + 2
    P2 = Hp * Wp + 2
    J = H * Wp

    w1f = _weights_flat(w1).astype(jnp.bfloat16)
    w2f = _weights_flat(w2).astype(jnp.bfloat16)
    xp = _reflect_pad_flat(x, Wp)          # stays in x.dtype (residual path)

    # Row tile for the K-stacked conv operand (9C x TJ bf16) — keep it ~2 MiB.
    row_tile = int(max(1, min(H, _STK_TARGET_BYTES // (9 * C * Wp * 2))))

    # Size the scoped-VMEM request from the actual footprint; clamp to
    # [32 MiB, 48 MiB] so we never request v7x's entire 64 MiB physical VMEM.
    isz = jnp.dtype(x.dtype).itemsize
    need = (2 * C * P2 * isz               # double-buffered input block
            + 2 * C * J * isz              # double-buffered output block
            + 2 * 2 * 9 * C * C * 2        # two bf16 weight mats, double-buffered
            + C * P2 * 2                   # padded-activation scratch (bf16)
            + 9 * C * row_tile * Wp * 2    # K-stacked operand
            + 6 * C * J * 4)               # conv / normalize / shift temporaries
    vmem_limit = int(max(min(int(need * 1.4), 48 << 20), 32 << 20))

    kernel = functools.partial(_resnet_block_kernel,
                               H=H, W=W, Wp=Wp, row_tile=row_tile)
    out = pl.pallas_call(
        kernel,
        out_shape=jax.ShapeDtypeStruct((N, C, J), x.dtype),
        grid=(N,),
        in_specs=[pl.BlockSpec((1, C, P2), lambda n: (n, 0, 0)),
                  # TODO(synk): mark the constant-index weight specs
                  # single-buffered (pipeline_mode=pl.Buffered(1)) once that is
                  # confirmed supported on the targeted jax version — saves a
                  # duplicate weight buffer worth of VMEM.
                  pl.BlockSpec((C, 9 * C), lambda n: (0, 0)),
                  pl.BlockSpec((C, 9 * C), lambda n: (0, 0))],
        out_specs=pl.BlockSpec((1, C, J), lambda n: (n, 0, 0)),
        scratch_shapes=[pltpu.VMEM((C, P2), jnp.bfloat16)],
        compiler_params=pltpu.CompilerParams(
            dimension_semantics=("parallel",),
            vmem_limit_bytes=vmem_limit),
    )(xp, w1f, w2f)

    # TODO(synk): when chaining the 9 CycleGAN blocks, keep this garbage-laned
    # (N, C, H*Wp) layout (and the padded input layout) as the canonical
    # inter-block activation format instead of repacking; and for N==1 on v7x,
    # add a C_out-parallel grid axis (requires un-fusing) so both TCs stay busy.
    return out.reshape(N, C, H, Wp)[:, :, :, :W]


# ---------------------------------------------------------------------------
# Pure-JAX f32 reference (sanity check of the kernel math)
# ---------------------------------------------------------------------------
def _reference(x, w1, b1, w2, b2):
    def conv_in(z, w, b):
        zp = jnp.pad(z, ((0, 0), (0, 0), (1, 1), (1, 1)), mode="reflect")
        c = lax.conv_general_dilated(
            zp, w, window_strides=(1, 1), padding="VALID",
            dimension_numbers=("NCHW", "OIHW", "NCHW"))
        c = c + b.reshape(1, -1, 1, 1)
        mean = jnp.mean(c, axis=(2, 3), keepdims=True)
        var = jnp.mean((c - mean) ** 2, axis=(2, 3), keepdims=True)
        return (c - mean) * lax.rsqrt(var + EPS)

    h = jnp.maximum(conv_in(x, w1, b1), 0.0)
    return x + conv_in(h, w2, b2)


if __name__ == "__main__":
    N, C, H, W = 2, 4, 16, 16  # dim = 4
    key = jax.random.PRNGKey(0)
    kx, kw1, kb1, kw2, kb2 = jax.random.split(key, 5)

    x = jax.random.normal(kx, (N, C, H, W), dtype=jnp.float32)
    w1 = jax.random.normal(kw1, (C, C, 3, 3), dtype=jnp.float32) * 0.1
    b1 = jax.random.normal(kb1, (C,), dtype=jnp.float32) * 0.1
    w2 = jax.random.normal(kw2, (C, C, 3, 3), dtype=jnp.float32) * 0.1
    b2 = jax.random.normal(kb2, (C,), dtype=jnp.float32) * 0.1

    out = jax.jit(resnet_block)(x, w1, b1, w2, b2)
    out = jax.block_until_ready(out)

    ref = _reference(x, w1, b1, w2, b2)
    assert out.shape == (N, C, H, W)
    # bf16 matmul operands / bf16 intermediate -> looser tolerance than pure f32.
    assert jnp.allclose(out, ref, atol=5e-2, rtol=5e-2), "mismatch vs reference"

    print("KERNEL_OK")
</pallas_src>

<mosaic_0001>
module attributes {stable_mosaic.version = 11 : i64} {
  func.func @_resnet_block_kernel(%arg0: i32, %arg1: memref<1x4x326xf32, #tpu.memory_space<vmem>>, %arg2: memref<4x36xbf16, #tpu.memory_space<vmem>>, %arg3: memref<4x36xbf16, #tpu.memory_space<vmem>>, %arg4: memref<1x4x288xf32, #tpu.memory_space<vmem>>, %arg5: memref<4x326xbf16, #tpu.memory_space<vmem>>) attributes {dimension_semantics = [#tpu.dimension_semantics<parallel>], iteration_bounds = array<i64: 2>, scalar_prefetch = 0 : i64, scratch_operands = 1 : i64, tpu.core_type = #tpu.core_type<tc>, window_params = [{transform_indices = @transform_0, window_bounds = array<i64: 1, 4, 326>}, {pipeline_mode = #tpu.pipeline_mode<synchronous>, transform_indices = @transform_1, window_bounds = array<i64: 4, 36>}, {pipeline_mode = #tpu.pipeline_mode<synchronous>, transform_indices = @transform_2, window_bounds = array<i64: 4, 36>}, {transform_indices = @transform_3, window_bounds = array<i64: 1, 4, 288>}]} {
    %c0 = arith.constant 0 : index
    %c0_0 = arith.constant 0 : index
    %c0_1 = arith.constant 0 : index
    %0 = vector.load %arg1[%c0, %c0_0, %c0_1] : memref<1x4x326xf32, #tpu.memory_space<vmem>>, vector<1x4x326xf32>
    %1 = vector.shape_cast %0 : vector<1x4x326xf32> to vector<4x326xf32>
    %2 = arith.truncf %1 : vector<4x326xf32> to vector<4x326xbf16>
    %c0_2 = arith.constant 0 : index
    %c0_3 = arith.constant 0 : index
    %3 = vector.load %arg5[%c0_2, %c0_3] : memref<4x326xbf16, #tpu.memory_space<vmem>>, vector<4x326xbf16>
    tpu.vector_store %arg5[%c0_2, %c0_3], %2 {strides = array<i32>} : memref<4x326xbf16, #tpu.memory_space<vmem>>, vector<4x326xbf16>,
    %c0_4 = arith.constant 0 : index
    %c0_5 = arith.constant 0 : index
    %4 = vector.load %arg2[%c0_4, %c0_5] : memref<4x36xbf16, #tpu.memory_space<vmem>>, vector<4x36xbf16>
    %cst = arith.constant 0.000000e+00 : f32
    %5 = vector.broadcast %cst : f32 to vector<4x1xf32>
    %cst_6 = arith.constant 0.000000e+00 : f32
    %6 = vector.broadcast %cst_6 : f32 to vector<4x1xf32>
    %c0_7 = arith.constant 0 : index
    %c0_8 = arith.constant 0 : index
    %7 = vector.load %arg5[%c0_7, %c0_8] : memref<4x326xbf16, #tpu.memory_space<vmem>>, vector<4x288xbf16>
    %c0_9 = arith.constant 0 : index
    %c1 = arith.constant 1 : index
    %8 = vector.load %arg5[%c0_9, %c1] : memref<4x326xbf16, #tpu.memory_space<vmem>>, vector<4x288xbf16>
    %c0_10 = arith.constant 0 : index
    %c2 = arith.constant 2 : index
    %9 = vector.load %arg5[%c0_10, %c2] : memref<4x326xbf16, #tpu.memory_space<vmem>>, vector<4x288xbf16>
    %c0_11 = arith.constant 0 : index
    %c18 = arith.constant 18 : index
    %10 = vector.load %arg5[%c0_11, %c18] : memref<4x326xbf16, #tpu.memory_space<vmem>>, vector<4x288xbf16>
    %c0_12 = arith.constant 0 : index
    %c19 = arith.constant 19 : index
    %11 = vector.load %arg5[%c0_12, %c19] : memref<4x326xbf16, #tpu.memory_space<vmem>>, vector<4x288xbf16>
    %c0_13 = arith.constant 0 : index
    %c20 = arith.constant 20 : index
    %12 = vector.load %arg5[%c0_13, %c20] : memref<4x326xbf16, #tpu.memory_space<vmem>>, vector<4x288xbf16>
    %c0_14 = arith.constant 0 : index
    %c36 = arith.constant 36 : index
    %13 = vector.load %arg5[%c0_14, %c36] : memref<4x326xbf16, #tpu.memory_space<vmem>>, vector<4x288xbf16>
    %c0_15 = arith.constant 0 : index
    %c37 = arith.constant 37 : index
    %14 = vector.load %arg5[%c0_15, %c37] : memref<4x326xbf16, #tpu.memory_space<vmem>>, vector<4x288xbf16>
    %c0_16 = arith.constant 0 : index
    %c38 = arith.constant 38 : index
    %15 = vector.load %arg5[%c0_16, %c38] : memref<4x326xbf16, #tpu.memory_space<vmem>>, vector<4x288xbf16>
    %16 = tpu.concatenate %7, %8, %9, %10, %11, %12, %13, %14, %15 in 0 : vector<4x288xbf16>, vector<4x288xbf16>, vector<4x288xbf16>, vector<4x288xbf16>, vector<4x288xbf16>, vector<4x288xbf16>, vector<4x288xbf16>, vector<4x288xbf16>, vector<4x288xbf16> -> vector<36x288xbf16>
    %cst_17 = arith.constant dense<0.000000e+00> : vector<4x288xf32>
    %17 = tpu.matmul %4, %16, %cst_17 {dimension_numbers = #tpu.dot_dimension_numbers<[1], [0], [0], [1], [0, 0, 1, 1], [], []>} : vector<4x36xbf16>, vector<36x288xbf16>, vector<4x288xf32> -> vector<4x288xf32>
    %18 = tpu.iota {dimensions = array<i32: 1>} : vector<1x288xi32>
    %c18_i32 = arith.constant 18 : i32
    %c0_i32 = arith.constant 0 : i32
    %19 = arith.cmpi eq, %c18_i32, %c0_i32 : i32
    %c1_i32 = arith.constant 1 : i32
    %20 = arith.select %19, %c1_i32, %c18_i32 : i32
    %21 = vector.broadcast %20 : i32 to vector<1x288xi32>
    %22 = arith.remsi %18, %21 : vector<1x288xi32>
    %c0_i32_18 = arith.constant 0 : i32
    %23 = vector.broadcast %c0_i32_18 : i32 to vector<1x288xi32>
    %24 = arith.cmpi ne, %22, %23 : vector<1x288xi32>
    %c0_i32_19 = arith.constant 0 : i32
    %25 = vector.broadcast %c0_i32_19 : i32 to vector<1x288xi32>
    %26 = arith.cmpi slt, %22, %25 : vector<1x288xi32>
    %c0_i32_20 = arith.constant 0 : i32
    %27 = arith.cmpi slt, %20, %c0_i32_20 : i32
    %28 = vector.broadcast %27 : i1 to vector<1x288xi1>
    %29 = vector.broadcast %28 : vector<1x288xi1> to vector<1x288xi1>
    %30 = arith.xori %26, %29 : vector<1x288xi1>
    %31 = arith.andi %30, %24 : vector<1x288xi1>
    %32 = vector.broadcast %20 : i32 to vector<1x288xi32>
    %33 = arith.addi %22, %32 : vector<1x288xi32>
    %34 = arith.select %31, %33, %22 : vector<1x288xi1>, vector<1x288xi32>
    %c16_i32 = arith.constant 16 : i32
    %35 = vector.broadcast %c16_i32 : i32 to vector<1x288xi32>
    %36 = arith.cmpi slt, %34, %35 : vector<1x288xi32>
    %cst_21 = arith.constant 0.000000e+00 : f32
    %37 = vector.shape_cast %36 : vector<1x288xi1> to vector<1x288xi1>
    %38 = vector.broadcast %37 : vector<1x288xi1> to vector<4x288xi1>
    %39 = vector.broadcast %cst_21 : f32 to vector<4x288xf32>
    %40 = arith.select %38, %17, %39 : vector<4x288xi1>, vector<4x288xf32>
    %cst_22 = arith.constant dense<0.000000e+00> : vector<4xf32>
    %41 = vector.multi_reduction <add>, %40, %cst_22 [1] : vector<4x288xf32> to vector<4xf32>
    %42 = vector.shape_cast %41 : vector<4xf32> to vector<4x1xf32>
    %43 = arith.addf %5, %42 : vector<4x1xf32>
    %44 = arith.mulf %40, %40 : vector<4x288xf32>
    %cst_23 = arith.constant dense<0.000000e+00> : vector<4xf32>
    %45 = vector.multi_reduction <add>, %44, %cst_23 [1] : vector<4x288xf32> to vector<4xf32>
    %46 = vector.shape_cast %45 : vector<4xf32> to vector<4x1xf32>
    %47 = arith.addf %6, %46 : vector<4x1xf32>
    %cst_24 = arith.constant 3.906250e-03 : f32
    %48 = vector.broadcast %cst_24 : f32 to vector<4x1xf32>
    %49 = arith.mulf %43, %48 : vector<4x1xf32>
    %cst_25 = arith.constant 3.906250e-03 : f32
    %50 = vector.broadcast %cst_25 : f32 to vector<4x1xf32>
    %51 = arith.mulf %47, %50 : vector<4x1xf32>
    %52 = arith.mulf %49, %49 : vector<4x1xf32>
    %53 = arith.subf %51, %52 : vector<4x1xf32>
    %cst_26 = arith.constant 0.000000e+00 : f32
    %54 = vector.broadcast %cst_26 : f32 to vector<4x1xf32>
    %55 = arith.maximumf %53, %54 : vector<4x1xf32>
    %cst_27 = arith.constant 9.99999974E-6 : f32
    %56 = vector.broadcast %cst_27 : f32 to vector<4x1xf32>
    %57 = arith.addf %55, %56 : vector<4x1xf32>
    %58 = math.rsqrt %57 : vector<4x1xf32>
    %59 = vector.broadcast %49 : vector<4x1xf32> to vector<4x288xf32>
    %60 = arith.subf %17, %59 : vector<4x288xf32>
    %61 = vector.broadcast %58 : vector<4x1xf32> to vector<4x288xf32>
    %62 = arith.mulf %60, %61 : vector<4x288xf32>
    %cst_28 = arith.constant 0.000000e+00 : f32
    %63 = vector.broadcast %cst_28 : f32 to vector<4x288xf32>
    %64 = arith.maximumf %62, %63 : vector<4x288xf32>
    %65 = arith.truncf %64 : vector<4x288xf32> to vector<4x288xbf16>
    %66 = tpu.iota {dimensions = array<i32: 1>} : vector<1x288xi32>
    %c18_i32_29 = arith.constant 18 : i32
    %c0_i32_30 = arith.constant 0 : i32
    %67 = arith.cmpi eq, %c18_i32_29, %c0_i32_30 : i32
    %c1_i32_31 = arith.constant 1 : i32
    %68 = arith.select %67, %c1_i32_31, %c18_i32_29 : i32
    %69 = vector.broadcast %68 : i32 to vector<1x288xi32>
    %70 = arith.remsi %66, %69 : vector<1x288xi32>
    %c0_i32_32 = arith.constant 0 : i32
    %71 = vector.broadcast %c0_i32_32 : i32 to vector<1x288xi32>
    %72 = arith.cmpi ne, %70, %71 : vector<1x288xi32>
    %c0_i32_33 = arith.constant 0 : i32
    %73 = vector.broadcast %c0_i32_33 : i32 to vector<1x288xi32>
    %74 = arith.cmpi slt, %70, %73 : vector<1x288xi32>
    %c0_i32_34 = arith.constant 0 : i32
    %75 = arith.cmpi slt, %68, %c0_i32_34 : i32
    %76 = vector.broadcast %75 : i1 to vector<1x288xi1>
    %77 = vector.broadcast %76 : vector<1x288xi1> to vector<1x288xi1>
    %78 = arith.xori %74, %77 : vector<1x288xi1>
    %79 = arith.andi %78, %72 : vector<1x288xi1>
    %80 = vector.broadcast %68 : i32 to vector<1x288xi32>
    %81 = arith.addi %70, %80 : vector<1x288xi32>
    %82 = arith.select %79, %81, %70 : vector<1x288xi1>, vector<1x288xi32>
    %83 = vector.extract_strided_slice %65 {offsets = [0, 1], sizes = [4, 287], strides = [1, 1]} : vector<4x288xbf16> to vector<4x287xbf16>
    %84 = vector.extract_strided_slice %65 {offsets = [0, 287], sizes = [4, 1], strides = [1, 1]} : vector<4x288xbf16> to vector<4x1xbf16>
    %85 = tpu.concatenate %83, %84 in 1 : vector<4x287xbf16>, vector<4x1xbf16> -> vector<4x288xbf16>
    %86 = vector.extract_strided_slice %65 {offsets = [0, 0], sizes = [4, 1], strides = [1, 1]} : vector<4x288xbf16> to vector<4x1xbf16>
    %87 = vector.extract_strided_slice %65 {offsets = [0, 0], sizes = [4, 287], strides = [1, 1]} : vector<4x288xbf16> to vector<4x287xbf16>
    %88 = tpu.concatenate %86, %87 in 1 : vector<4x1xbf16>, vector<4x287xbf16> -> vector<4x288xbf16>
    %89 = vector.extract_strided_slice %65 {offsets = [0, 0], sizes = [4, 3], strides = [1, 1]} : vector<4x288xbf16> to vector<4x3xbf16>
    %90 = vector.extract_strided_slice %65 {offsets = [0, 0], sizes = [4, 285], strides = [1, 1]} : vector<4x288xbf16> to vector<4x285xbf16>
    %91 = tpu.concatenate %89, %90 in 1 : vector<4x3xbf16>, vector<4x285xbf16> -> vector<4x288xbf16>
    %c0_i32_35 = arith.constant 0 : i32
    %92 = vector.broadcast %c0_i32_35 : i32 to vector<1x288xi32>
    %93 = arith.cmpi eq, %82, %92 : vector<1x288xi32>
    %c17_i32 = arith.constant 17 : i32
    %94 = vector.broadcast %c17_i32 : i32 to vector<1x288xi32>
    %95 = arith.cmpi eq, %82, %94 : vector<1x288xi32>
    %96 = vector.shape_cast %95 : vector<1x288xi1> to vector<1x288xi1>
    %97 = vector.broadcast %96 : vector<1x288xi1> to vector<4x288xi1>
    %98 = arith.select %97, %91, %88 : vector<4x288xi1>, vector<4x288xbf16>
    %99 = vector.shape_cast %93 : vector<1x288xi1> to vector<1x288xi1>
    %100 = vector.broadcast %99 : vector<1x288xi1> to vector<4x288xi1>
    %101 = arith.select %100, %85, %98 : vector<4x288xi1>, vector<4x288xbf16>
    %102 = vector.extract_strided_slice %101 {offsets = [0, 18], sizes = [4, 18], strides = [1, 1]} : vector<4x288xbf16> to vector<4x18xbf16>
    %103 = vector.extract_strided_slice %101 {offsets = [0, 252], sizes = [4, 18], strides = [1, 1]} : vector<4x288xbf16> to vector<4x18xbf16>
    %104 = vector.extract_strided_slice %101 {offsets = [0, 0], sizes = [4, 2], strides = [1, 1]} : vector<4x288xbf16> to vector<4x2xbf16>
    %105 = tpu.concatenate %102, %101, %103, %104 in 1 : vector<4x18xbf16>, vector<4x288xbf16>, vector<4x18xbf16>, vector<4x2xbf16> -> vector<4x326xbf16>
    %c0_36 = arith.constant 0 : index
    %c0_37 = arith.constant 0 : index
    %106 = vector.load %arg5[%c0_36, %c0_37] : memref<4x326xbf16, #tpu.memory_space<vmem>>, vector<4x326xbf16>
    tpu.vector_store %arg5[%c0_36, %c0_37], %105 {strides = array<i32>} : memref<4x326xbf16, #tpu.memory_space<vmem>>, vector<4x326xbf16>,
    %c0_38 = arith.constant 0 : index
    %c0_39 = arith.constant 0 : index
    %107 = vector.load %arg3[%c0_38, %c0_39] : memref<4x36xbf16, #tpu.memory_space<vmem>>, vector<4x36xbf16>
    %cst_40 = arith.constant 0.000000e+00 : f32
    %108 = vector.broadcast %cst_40 : f32 to vector<4x1xf32>
    %cst_41 = arith.constant 0.000000e+00 : f32
    %109 = vector.broadcast %cst_41 : f32 to vector<4x1xf32>
    %c0_42 = arith.constant 0 : index
    %c0_43 = arith.constant 0 : index
    %110 = vector.load %arg5[%c0_42, %c0_43] : memref<4x326xbf16, #tpu.memory_space<vmem>>, vector<4x288xbf16>
    %c0_44 = arith.constant 0 : index
    %c1_45 = arith.constant 1 : index
    %111 = vector.load %arg5[%c0_44, %c1_45] : memref<4x326xbf16, #tpu.memory_space<vmem>>, vector<4x288xbf16>
    %c0_46 = arith.constant 0 : index
    %c2_47 = arith.constant 2 : index
    %112 = vector.load %arg5[%c0_46, %c2_47] : memref<4x326xbf16, #tpu.memory_space<vmem>>, vector<4x288xbf16>
    %c0_48 = arith.constant 0 : index
    %c18_49 = arith.constant 18 : index
    %113 = vector.load %arg5[%c0_48, %c18_49] : memref<4x326xbf16, #tpu.memory_space<vmem>>, vector<4x288xbf16>
    %c0_50 = arith.constant 0 : index
    %c19_51 = arith.constant 19 : index
    %114 = vector.load %arg5[%c0_50, %c19_51] : memref<4x326xbf16, #tpu.memory_space<vmem>>, vector<4x288xbf16>
    %c0_52 = arith.constant 0 : index
    %c20_53 = arith.constant 20 : index
    %115 = vector.load %arg5[%c0_52, %c20_53] : memref<4x326xbf16, #tpu.memory_space<vmem>>, vector<4x288xbf16>
    %c0_54 = arith.constant 0 : index
    %c36_55 = arith.constant 36 : index
    %116 = vector.load %arg5[%c0_54, %c36_55] : memref<4x326xbf16, #tpu.memory_space<vmem>>, vector<4x288xbf16>
    %c0_56 = arith.constant 0 : index
    %c37_57 = arith.constant 37 : index
    %117 = vector.load %arg5[%c0_56, %c37_57] : memref<4x326xbf16, #tpu.memory_space<vmem>>, vector<4x288xbf16>
    %c0_58 = arith.constant 0 : index
    %c38_59 = arith.constant 38 : index
    %118 = vector.load %arg5[%c0_58, %c38_59] : memref<4x326xbf16, #tpu.memory_space<vmem>>, vector<4x288xbf16>
    %119 = tpu.concatenate %110, %111, %112, %113, %114, %115, %116, %117, %118 in 0 : vector<4x288xbf16>, vector<4x288xbf16>, vector<4x288xbf16>, vector<4x288xbf16>, vector<4x288xbf16>, vector<4x288xbf16>, vector<4x288xbf16>, vector<4x288xbf16>, vector<4x288xbf16> -> vector<36x288xbf16>
    %cst_60 = arith.constant dense<0.000000e+00> : vector<4x288xf32>
    %120 = tpu.matmul %107, %119, %cst_60 {dimension_numbers = #tpu.dot_dimension_numbers<[1], [0], [0], [1], [0, 0, 1, 1], [], []>} : vector<4x36xbf16>, vector<36x288xbf16>, vector<4x288xf32> -> vector<4x288xf32>
    %cst_61 = arith.constant 0.000000e+00 : f32
    %121 = vector.shape_cast %36 : vector<1x288xi1> to vector<1x288xi1>
    %122 = vector.broadcast %121 : vector<1x288xi1> to vector<4x288xi1>
    %123 = vector.broadcast %cst_61 : f32 to vector<4x288xf32>
    %124 = arith.select %122, %120, %123 : vector<4x288xi1>, vector<4x288xf32>
    %cst_62 = arith.constant dense<0.000000e+00> : vector<4xf32>
    %125 = vector.multi_reduction <add>, %124, %cst_62 [1] : vector<4x288xf32> to vector<4xf32>
    %126 = vector.shape_cast %125 : vector<4xf32> to vector<4x1xf32>
    %127 = arith.addf %108, %126 : vector<4x1xf32>
    %128 = arith.mulf %124, %124 : vector<4x288xf32>
    %cst_63 = arith.constant dense<0.000000e+00> : vector<4xf32>
    %129 = vector.multi_reduction <add>, %128, %cst_63 [1] : vector<4x288xf32> to vector<4xf32>
    %130 = vector.shape_cast %129 : vector<4xf32> to vector<4x1xf32>
    %131 = arith.addf %109, %130 : vector<4x1xf32>
    %cst_64 = arith.constant 3.906250e-03 : f32
    %132 = vector.broadcast %cst_64 : f32 to vector<4x1xf32>
    %133 = arith.mulf %127, %132 : vector<4x1xf32>
    %cst_65 = arith.constant 3.906250e-03 : f32
    %134 = vector.broadcast %cst_65 : f32 to vector<4x1xf32>
    %135 = arith.mulf %131, %134 : vector<4x1xf32>
    %136 = arith.mulf %133, %133 : vector<4x1xf32>
    %137 = arith.subf %135, %136 : vector<4x1xf32>
    %cst_66 = arith.constant 0.000000e+00 : f32
    %138 = vector.broadcast %cst_66 : f32 to vector<4x1xf32>
    %139 = arith.maximumf %137, %138 : vector<4x1xf32>
    %cst_67 = arith.constant 9.99999974E-6 : f32
    %140 = vector.broadcast %cst_67 : f32 to vector<4x1xf32>
    %141 = arith.addf %139, %140 : vector<4x1xf32>
    %142 = math.rsqrt %141 : vector<4x1xf32>
    %c0_68 = arith.constant 0 : index
    %c0_69 = arith.constant 0 : index
    %c19_70 = arith.constant 19 : index
    %143 = vector.load %arg1[%c0_68, %c0_69, %c19_70] : memref<1x4x326xf32, #tpu.memory_space<vmem>>, vector<1x4x288xf32>
    %144 = vector.shape_cast %143 : vector<1x4x288xf32> to vector<4x288xf32>
    %145 = vector.broadcast %133 : vector<4x1xf32> to vector<4x288xf32>
    %146 = arith.subf %120, %145 : vector<4x288xf32>
    %147 = vector.broadcast %142 : vector<4x1xf32> to vector<4x288xf32>
    %148 = arith.mulf %146, %147 : vector<4x288xf32>
    %149 = arith.addf %144, %148 : vector<4x288xf32>
    %c0_71 = arith.constant 0 : index
    %c0_72 = arith.constant 0 : index
    %c0_73 = arith.constant 0 : index
    %150 = vector.load %arg4[%c0_71, %c0_72, %c0_73] : memref<1x4x288xf32, #tpu.memory_space<vmem>>, vector<1x4x288xf32>
    %151 = vector.shape_cast %150 : vector<1x4x288xf32> to vector<4x288xf32>
    %152 = vector.shape_cast %149 : vector<4x288xf32> to vector<1x4x288xf32>
    tpu.vector_store %arg4[%c0_71, %c0_72, %c0_73], %152 {strides = array<i32>} : memref<1x4x288xf32, #tpu.memory_space<vmem>>, vector<1x4x288xf32>,
    return
  }
  func.func @transform_0(%arg0: i32) -> (i32, i32, i32) {
    %c0_i32 = arith.constant 0 : i32
    %c0_i32_0 = arith.constant 0 : i32
    %c0_i32_1 = arith.constant 0 : i32
    return %arg0, %c0_i32, %c0_i32_0 : i32, i32, i32
  }
  func.func @transform_1(%arg0: i32) -> (i32, i32) {
    %c0_i32 = arith.constant 0 : i32
    %c0_i32_0 = arith.constant 0 : i32
    %c0_i32_1 = arith.constant 0 : i32
    return %c0_i32, %c0_i32_0 : i32, i32
  }
  func.func @transform_2(%arg0: i32) -> (i32, i32) {
    %c0_i32 = arith.constant 0 : i32
    %c0_i32_0 = arith.constant 0 : i32
    %c0_i32_1 = arith.constant 0 : i32
    return %c0_i32, %c0_i32_0 : i32, i32
  }
  func.func @transform_3(%arg0: i32) -> (i32, i32, i32) {
    %c0_i32 = arith.constant 0 : i32
    %c0_i32_0 = arith.constant 0 : i32
    %c0_i32_1 = arith.constant 0 : i32
    return %arg0, %c0_i32, %c0_i32_0 : i32, i32, i32
  }
}

</mosaic_0001>

<bundles_post_ra>
// kernel: resnet_block.1
= control target key start
LH: loop header
LB: loop body
LE: loop exit
PB: predicated region body
PF: predicated region fallthrough
CT: control target
= control target key end

     0   :  { %s1238_s12 = smov 0   ;;  %s1556_s0 = inlined_call_operand.vmem [shape: f32[2,4,326], index: 0, kind: input, shape index: {}]   ;;  %s1557_s1 = inlined_call_operand.vmem [shape: bf16[4,36], index: 1, kind: input, shape index: {}]   ;;  %s1558_s2 = inlined_call_operand.vmem [shape: bf16[4,36], index: 2, kind: input, shape index: {}]   ;;  %s1559_s3 = inlined_call_operand.vmem [shape: f32[2,4,288], index: 3, kind: output, shape index: {}]  }
   0x1 LB: > { %s1152_s13 = sadd.s32 4294967295, %s1201_s12   ;;  %p1156_p0 = scmp.ge.s32.totalorder %s1201_s12, 1  ;;  %s1201_s12 = sphi %s1238_s12, %s13_s12  }
   0x2   : > { %p137_p1 = scmp.lt.s32.totalorder %s1201_s12, 3 }
   0x4   : > { %p138_p2 = pnand %p1156_p0, %p137_p1 }
   0x5   : > { %p161_p3 = scmp.lt.s32.totalorder (!%p138_p2), %s1152_s13, 1  ;;  %s1203_s18 = smov (!%p138_p2), 127  }
   0x6   : > { %141 = sbr.rel (%p138_p2) target bundleno = 1568 (0x620), region = 32  ;;  %s1204_s19 = smov (!%p138_p2), 126  }
   0x7   : > { %s1205_s20 = smov (!%p138_p2), 110   ;;  %s1206_s21 = smov (!%p138_p2), 109  }
   0x8   : > { %s1207_s22 = smov (!%p138_p2), 108   ;;  %s1208_s23 = smov (!%p138_p2), 92  }
   0x9   : > { %s1209_s24 = smov (!%p138_p2), 91   ;;  %s1210_s25 = smov (!%p138_p2), 90  }
   0xa   : > { %s1212_s28 = smov (!%p138_p2), 1   ;;  %s1213_s29 = smov (!%p138_p2), 3  }
   0xb   : > { %s1607_s13 = smov (!%p161_p3, %s1152_s13), 1  ;;  %vm194_vm0 = vcmask 1041408   ;;  %vm205_vm1 = vcmask 1043458   ;;  %vm207_vm3 = vcmask 570372   ;;  %vm198_vm4 = vcmask 1045508   ;;  %s1214_s30 = smov 18  }
   0xc   : > { %s1167_s14 = smul.u32 12, %s1607_s13  ;;  %vm206_vm2 = vmor %vm205_vm1, %vm194_vm0  ;;  %vm202_vm5 = vcmask 1043456   ;;  %vm1566_vm7 = vcmask 736256   ;;  %vm298_vm8 = vcmask 883712   ;;  %vm1565_vm9 = vcmask 752640   ;;  %s1215_s4 = smov 54  }
   0xd   : > { %vm1260_vm6 = vmor %vm207_vm3, %vm206_vm2  ;;  %vm1571_vm10 = vcmask 891904   ;;  %vm1564_vm11 = vcmask 744448   ;;  %vm1562_vm12 = vcmask 1045504   ;;  %vm1560_vm13 = vcmask 293888   ;;  %s1216_s5 = smov 68   ;;  %s1217_s8 = smov 19  }
   0xe   : > { %s1254_s17 = scalar_lea.vmem %s1556_s0, %s1167_s14  ;;  %vm231_vm14 = vcmask 1039360   ;;  %vm1563_vm15 = vcmask 1031168   ;;  %vm1561_vm1 = vcmask 900096   ;;  %s170_s11 = scalar_lea.vmem %s1559_s3, %s1167_s14 }
   0xf   : > { %v174_v0 = vld [vmem:[%s1254_s17] sm:$0xff]  ;;  %v175_v1 = vld [vmem:[%s1254_s17 + $0x8] sm:$0xf] }
  0x10   : > { %178 = vst [vmem:[#allocation1] ss:$2 sm:$0xff] %v174_v0 }
  0x11   : > { %180 = vst [vmem:[#allocation1 + $0x10] ss:$2 sm:$0xff] %v175_v1 }
  0x17   : > { %v181_v2 = vld.sshfl [vmem:[#allocation1] sm:$0xff pattern:$0x75316420]  ;;  %v182_v3 = vld.sshfl [vmem:[#allocation1 + $0x8] sm:$0xff pattern:$0x75316420] }
  0x18   : > { %v183_v4 = vld.sshfl [vmem:[#allocation1 + $0x10] sm:$0xff pattern:$0x75316420]  ;;  %v187_v5 = vpack.c.bf16 %v182_v3, %v181_v2 }
  0x19   : > { %v188_v6 = vpack.c.bf16 %v183_v4, %v183_v4 }
  0x1a   : > { %v191_v7 = vrot.slane %v187_v5, 2 }
  0x1b   : > { %v192_v8 = vrot.slane %v188_v6, 4  ;;  %v193_v9 = vrot.slane %v188_v6, 6 }
  0x1c   : > { %v197_v10 = vsel %vm194_vm0, %v187_v5, %v191_v7 }
  0x1d   : > { %v201_v12 = vsel %vm198_vm4, %v192_v8, %v193_v9 }
  0x1e   : > { %v203_v13 = vsel %vm202_vm5, %v197_v10, %v201_v12 }
  0x1f   : > { %209 = vst.msk [vmem:[#allocation2] sm:$0x3f] %vm1260_vm6, %v203_v13 }
  0x26   : > { %v211_v14 = vld [vmem:[#allocation2] sm:$0x3f] }
  0x27   : > { %213 = vst [vmem:[#allocation1] ss:$4 sm:$0xff] %v211_v14 }
  0x2e   : > { %v1267_v15 = vld.sshfl [vmem:[#allocation1] sm:$0xff pattern:$0x73625140]  ;;  %v1269_v16 = vld.sshfl [vmem:[#allocation1 + $0x8] sm:$0xff pattern:$0x73625140] }
  0x2f   : > { %v1271_v17 = vld.sshfl [vmem:[#allocation1 + $0x10] sm:$0xff pattern:$0x73625140] }
  0x30   : > { %218 = vst [vmem:[#allocation1 + $0x1] ss:$4 sm:$0xff] %v211_v14 }
  0x37   : > { %v223_v18 = vld.sshfl [vmem:[#allocation1 + $0x10] sm:$0xff pattern:$0x73625140]  ;;  %v219_v19 = vld.sshfl [vmem:[#allocation1] sm:$0xff pattern:$0x73625140] }
  0x38   : > { %229 = vrot.lane.b32.xlu2 %v223_v18, %s1203_s18  ;;  %v221_v20 = vld.sshfl [vmem:[#allocation1 + $0x8] sm:$0xff pattern:$0x73625140] }
  0x39   : > { %235 = vst [vmem:[#allocation1 + $0x2] ss:$4 sm:$0xff] %v211_v14 }
  0x40   : > { %v240_v21 = vld.sshfl [vmem:[#allocation1 + $0x10] sm:$0xff pattern:$0x73625140]  ;;  %v236_v22 = vld.sshfl [vmem:[#allocation1] sm:$0xff pattern:$0x73625140] }
  0x41   : > { %246 = vrot.lane.b32.xlu2 %v240_v21, %s1204_s19  ;;  %v238_v23 = vld.sshfl [vmem:[#allocation1 + $0x8] sm:$0xff pattern:$0x73625140] }
  0x42   : > { %252 = vst [vmem:[#allocation1 + $0x3] ss:$4 sm:$0xff] %v211_v14 }
  0x49   : > { %v253_v24 = vld.sshfl [vmem:[#allocation1] sm:$0xff pattern:$0x73625140]  ;;  %v255_v25 = vld.sshfl [vmem:[#allocation1 + $0x8] sm:$0xff pattern:$0x73625140] }
  0x4a   : > { %v257_v26 = vld.sshfl [vmem:[#allocation1 + $0x10] sm:$0xff pattern:$0x73625140] }
  0x4b   : > { %268 = vst [vmem:[#allocation1] ss:$4 sm:$0xff] %v211_v14  ;;  %263 = vrot.lane.b32.xlu2 %v257_v26, %s1205_s20 }
  0x52   : > { %v273_v27 = vld.sshfl [vmem:[#allocation1 + $0x10] sm:$0xff pattern:$0x73625140]  ;;  %v271_v28 = vld.sshfl [vmem:[#allocation1 + $0x8] sm:$0xff pattern:$0x73625140] }
  0x53   : > { %279 = vrot.lane.b32.xlu0 %v273_v27, %s1206_s21  ;;  %v269_v29 = vld.sshfl [vmem:[#allocation1] sm:$0xff pattern:$0x73625140]  ;;  %277 = vrot.lane.b32.xlu2 %v271_v28, %s1206_s21 }
  0x54   : > { %275 = vrot.lane.b32.xlu1 %v269_v29, %s1206_s21  ;;  %285 = vst [vmem:[#allocation1 + $0x1] ss:$4 sm:$0xff] %v211_v14  ;;  %v210_v27 = vld [vmem:[%s1557_s1] sm:$0x3] }
  0x5b   : > { %v290_v30 = vld.sshfl [vmem:[#allocation1 + $0x10] sm:$0xff pattern:$0x73625140]  ;;  %v286_v31 = vld.sshfl [vmem:[#allocation1] sm:$0xff pattern:$0x73625140]  ;;  %242 = vrot.lane.b32.xlu2 %v236_v22, %s1204_s19 }
  0x5c   : > { %296 = vrot.lane.b32.xlu1 %v290_v30, %s1207_s22  ;;  %292 = vrot.lane.b32.xlu0 %v286_v31, %s1207_s22  ;;  %v288_v32 = vld.sshfl [vmem:[#allocation1 + $0x8] sm:$0xff pattern:$0x73625140] }
  0x5d   : > { %302 = vst [vmem:[#allocation1 + $0x2] ss:$4 sm:$0xff] %v211_v14 }
  0x64   : > { %294 = vrot.lane.b32.xlu1 %v288_v32, %s1207_s22  ;;  %v303_v33 = vld.sshfl [vmem:[#allocation1] sm:$0xff pattern:$0x73625140]  ;;  %v305_v34 = vld.sshfl [vmem:[#allocation1 + $0x8] sm:$0xff pattern:$0x73625140] }
  0x65   : > { %309 = vrot.lane.b32.xlu0 %v303_v33, %s1208_s23  ;;  %v307_v35 = vld.sshfl [vmem:[#allocation1 + $0x10] sm:$0xff pattern:$0x73625140] }
  0x66   : > { %319 = vst [vmem:[#allocation1 + $0x3] ss:$4 sm:$0xff] %v211_v14 }
  0x6c   : > { %313 = vrot.lane.b32.xlu1 %v307_v35, %s1208_s23 }
  0x6d   : > { %v324_v36 = vld.sshfl [vmem:[#allocation1 + $0x10] sm:$0xff pattern:$0x73625140]  ;;  %v322_v37 = vld.sshfl [vmem:[#allocation1 + $0x8] sm:$0xff pattern:$0x73625140] }
  0x6e   : > { %330 = vrot.lane.b32.xlu0 %v324_v36, %s1209_s24  ;;  %v320_v38 = vld.sshfl [vmem:[#allocation1] sm:$0xff pattern:$0x73625140] }
  0x6f   : > { %335 = vst [vmem:[#allocation1] ss:$4 sm:$0xff] %v211_v14 }
  0x74   : > { %311 = vrot.lane.b32.xlu1 %v305_v34, %s1208_s23 }
  0x76   : > { %326 = vrot.lane.b32.xlu0 %v320_v38, %s1209_s24  ;;  %v336_v39 = vld.sshfl [vmem:[#allocation1] sm:$0xff pattern:$0x73625140]  ;;  %v340_v40 = vld.sshfl [vmem:[#allocation1 + $0x10] sm:$0xff pattern:$0x73625140] }
  0x77   : > { %342 = vrot.lane.b32.xlu2 %v336_v39, %s1210_s25  ;;  %v338_v41 = vld.sshfl [vmem:[#allocation1 + $0x8] sm:$0xff pattern:$0x73625140] }
  0x7c   : > { %328 = vrot.lane.b32.xlu1 %v322_v37, %s1209_s24 }
  0x7e   : > { %346 = vrot.lane.b32.xlu0 %v340_v40, %s1210_s25 }
  0x7f   : > { %344 = vrot.lane.b32.xlu2 %v338_v41, %s1210_s25 }
  0x84   : > { %227 = vrot.lane.b32.xlu1 %v221_v20, %s1203_s18 }
  0x86   : > { %225 = vrot.lane.b32.xlu0 %v219_v19, %s1203_s18 }
  0x87   : > { %261 = vrot.lane.b32.xlu2 %v255_v25, %s1205_s20 }
  0x8c   : > { %259 = vrot.lane.b32.xlu1 %v253_v24, %s1205_s20 }
  0x8e   : > { %244 = vrot.lane.b32.xlu0 %v238_v23, %s1204_s19 }
  0x92   : > { %v1297_v42 = vpop.permute.xlu2 %229 }
  0x93   : > { %v356_v14 = vsel %vm194_vm0, %v1271_v17, %v1297_v42 }
  0x9b   : > { %v1299_v43 = vpop.permute.xlu2 %246 }
  0x9c   : > { %v362_v23 = vsel %vm202_vm5, %v356_v14, %v1299_v43 }
  0xa5   : > { %v1301_v44 = vpop.permute.xlu2 %263 }
  0xa6   : > { %v371_v26 = vsel %vm1562_vm12, %v362_v23, %v1301_v44 }
  0xad   : > { %v278_v45 = vpop.permute.xlu2 %277 }
  0xb5   : > { %v1303_v48 = vpop.permute.xlu2 %242 }
  0xc5   : > { %v280_v46 = vpop.permute.xlu0 %279 }
  0xc6   : > { %v276_v47 = vpop.permute.xlu1 %275  ;;  %v283_v18 = vsel %vm1571_vm10, %v278_v45, %v280_v46 }
  0xc7   : > { %v282_v63 = vsel %vm1571_vm10, %v276_v47, %v278_v45 }
  0xce   : > { %v297_v49 = vpop.permute.xlu1 %296  ;;  %v293_v50 = vpop.permute.xlu0 %292 }
  0xcf   : > { %v381_v6 = vsel %vm194_vm0, %v280_v46, %v297_v49 }
  0xd1   : > { %v343_v51 = vpop.permute.xlu2 %342 }
  0xd6   : > { %v295_v52 = vpop.permute.xlu1 %294 }
  0xd7   : > { %v310_v53 = vpop.permute.xlu0 %309  ;;  %v299_v61 = vsel %vm298_vm8, %v293_v50, %v295_v52  ;;  %v300_v7 = vsel %vm298_vm8, %v295_v52, %v297_v49 }
  0xd8   : > { %v375_v0 = vsel %vm194_vm0, %v282_v63, %v299_v61  ;;  %v378_v20 = vsel %vm194_vm0, %v283_v18, %v300_v7 }
  0xd9   : > { %v345_v54 = vpop.permute.xlu2 %344 }
  0xda   : > { %v349_v55 = vsel %vm1566_vm7, %v343_v51, %v345_v54 }
  0xdb   : > { %v402_v56 = vsel %vm194_vm0, %v349_v55, 0 }
  0xdc   : > { %415 = vmatpush.bf16.msra.mxu0 %v402_v56 }
  0xde   : > { %v314_v57 = vpop.permute.xlu1 %313 }
  0xdf   : > { %v387_v10 = vsel %vm202_vm5, %v381_v6, %v314_v57 }
  0xe0   : > { %v331_v58 = vpop.permute.xlu0 %330 }
  0xe1   : > { %v395_v21 = vsel %vm1562_vm12, %v387_v10, %v331_v58  ;;  %v262_v31 = vpop.permute.xlu2 %261 }
  0xe2   : > { %v267_v38 = vsel %vm1561_vm1, %v262_v31, %v1301_v44 }
  0xe6   : > { %v312_v59 = vpop.permute.xlu1 %311 }
  0xe7   : > { %v316_v62 = vsel %vm1565_vm9, %v310_v53, %v312_v59  ;;  %v317_v12 = vsel %vm1565_vm9, %v312_v59, %v314_v57 }
  0xe8   : > { %v327_v60 = vpop.permute.xlu0 %326  ;;  %v383_v3 = vsel %vm202_vm5, %v375_v0, %v316_v62  ;;  %v385_v22 = vsel %vm202_vm5, %v378_v20, %v317_v12 }
  0xee   : > { %v329_v1 = vpop.permute.xlu1 %328 }
  0xef   : > { %v333_v2 = vsel %vm1564_vm11, %v327_v60, %v329_v1  ;;  %v334_v19 = vsel %vm1564_vm11, %v329_v1, %v331_v58 }
  0xf0   : > { %v347_v4 = vpop.permute.xlu0 %346  ;;  %v389_v5 = vsel %vm1562_vm12, %v383_v3, %v333_v2  ;;  %v392_v24 = vsel %vm1562_vm12, %v385_v22, %v334_v19 }
  0xf1   : > { %v408_v8 = vsel %vm194_vm0, %v347_v4, 0  ;;  %416 = vmatpush.bf16.msra.mxu0 %v389_v5  ;;  %v350_v9 = vsel %vm1566_vm7, %v345_v54, %v347_v4  ;;  %v1211_v4 = vmov 0  }
  0xf2   : > { %441 = vmatpush.bf16.msra.mxu2 %v408_v8  ;;  %v405_v13 = vsel %vm194_vm0, %v350_v9, 0 }
  0xf3   : > { %428 = vmatpush.bf16.msra.mxu1 %v405_v13 }
  0xf6   : > { %442 = vmatpush.bf16.msra.mxu2 %v395_v21  ;;  %v228_v25 = vpop.permute.xlu1 %227 }
  0xf7   : > { %429 = vmatpush.bf16.msra.mxu1 %v392_v24  ;;  %v233_v28 = vsel %vm231_vm14, %v228_v25, %v1297_v42 }
  0xf8   : > { %v226_v17 = vpop.permute.xlu0 %225  ;;  %v354_v34 = vsel %vm194_vm0, %v1269_v16, %v233_v28 }
  0xf9   : > { %v232_v29 = vsel %vm231_vm14, %v226_v17, %v228_v25 }
  0xfa   : > { %443 = vmatpush.bf16.msra.mxu2 %v371_v26  ;;  %v352_v35 = vsel %vm194_vm0, %v1267_v15, %v232_v29  ;;  %v449_v15 = vlaneseq }
  0xfc   : > { %v450_v42 = vand.u32 127, %v449_v15 }
  0xfd   : > { %1161 = vmatmul.msk.bf16.vlgmr.msra.gmra.mxu2 %vm1560_vm13, %v210_v27 }
  0xfe   : > { %v260_v30 = vpop.permute.xlu1 %259  ;;  %v1360_v45 = vadd.s32 256, %v450_v42  ;;  %v456_v44 = vand.u32 65535, %v450_v42 }
  0xff   : > { %v266_v33 = vsel %vm1561_vm1, %v260_v30, %v262_v31 }
 0x100   : > { %v245_v32 = vpop.permute.xlu0 %244  ;;  %v514_v47 = vand.u32 65535, %v1360_v45  ;;  %v460_v49 = vmul.u32 58254, %v456_v44  ;;  %v515_v51 = vshrl.u32 %v1360_v45, 16  ;;  %v459_v53 = vmul.u32 14564, %v456_v44 }
 0x101   : > { %v249_v36 = vsel %vm1563_vm15, %v1303_v48, %v245_v32  ;;  %v250_v37 = vsel %vm1563_vm15, %v245_v32, %v1299_v43  ;;  %v1358_v43 = vadd.s32 128, %v450_v42  ;;  %v457_v48 = vshrl.u32 %v450_v42, 16 }
 0x102   : > { %v358_v39 = vsel %vm202_vm5, %v352_v35, %v249_v36  ;;  %v360_v40 = vsel %vm202_vm5, %v354_v34, %v250_v37  ;;  %v518_v52 = vmul.u32 58254, %v514_v47  ;;  %v463_v55 = vshll.u32 %v460_v49, 16 }
 0x103   : > { %v365_v41 = vsel %vm1562_vm12, %v358_v39, %v266_v33  ;;  %v368_v16 = vsel %vm1562_vm12, %v360_v40, %v267_v38  ;;  %v485_v46 = vand.u32 65535, %v1358_v43  ;;  %v486_v50 = vshrl.u32 %v1358_v43, 16 }
 0x104   : > { %417 = vmatpush.bf16.msra.mxu0 %v365_v41  ;;  %430 = vmatpush.bf16.msra.mxu1 %v368_v16  ;;  %v461_v54 = vmul.u32 14564, %v457_v48  ;;  %v517_v58 = vmul.u32 14564, %v514_v47  ;;  %v519_v59 = vmul.u32 14564, %v515_v51  ;;  %v521_v60 = vshll.u32 %v518_v52, 16 }
 0x105   : > { %v489_v56 = vmul.u32 58254, %v485_v46  ;;  %v490_v57 = vmul.u32 14564, %v486_v50  ;;  %v462_v61 = vmul.u32 58254, %v457_v48  ;;  %vm467_vm2 = vc.u32 %v459_v53, %v463_v55 }
 0x106   : > { %v465_v62 = vshll.u32 %v461_v54, 16  ;;  %v469_v63 = vadd.s32 %v463_v55, %v459_v53  ;;  %v523_v0 = vshll.u32 %v519_v59, 16  ;;  %vm525_vm3 = vc.u32 %v517_v58, %v521_v60 }
 0x107   : > { %1159 = vmatmul.msk.bf16.vlgmr.msra.gmra.mxu0 %vm1560_vm13, %v210_v27  ;;  %1160 = vmatmul.msk.bf16.vlgmr.msra.gmra.mxu1 %vm1560_vm13, %v210_v27  ;;  %v527_v1 = vadd.s32 %v521_v60, %v517_v58  ;;  %v488_v2 = vmul.u32 14564, %v485_v46  ;;  %v520_v3 = vmul.u32 58254, %v515_v51  ;;  %v468_v5 = vsel %vm467_vm2, 1, %v1211_v4 }
 0x108   : > { %vm471_vm4 = vc.u32 %v469_v63, %v465_v62  ;;  %v492_v6 = vshll.u32 %v489_v56, 16  ;;  %v526_v7 = vsel %vm525_vm3, 1, %v1211_v4  ;;  %v464_v8 = vshrl.u32 %v460_v49, 16 }
 0x109   : > { %v470_v9 = vadd.s32 %v468_v5, %v462_v61  ;;  %vm529_vm13 = vc.u32 %v527_v1, %v523_v0  ;;  %v472_v10 = vsel %vm471_vm4, 1, %v1211_v4  ;;  %v491_v12 = vmul.u32 58254, %v486_v50 }
 0x10a   : > { %v494_v13 = vshll.u32 %v490_v57, 16  ;;  %v466_v14 = vshrl.u32 %v461_v54, 16  ;;  %v528_v19 = vadd.s32 %v526_v7, %v520_v3  ;;  %vm496_vm1 = vc.u32 %v488_v2, %v492_v6 }
 0x10b   : > { %v474_v18 = vadd.s32 %v472_v10, %v470_v9  ;;  %v498_v20 = vadd.s32 %v492_v6, %v488_v2  ;;  %v530_v21 = vsel %vm529_vm13, 1, %v1211_v4  ;;  %v497_v23 = vsel %vm496_vm1, 1, %v1211_v4 }
 0x10c   : > { %v493_v24 = vshrl.u32 %v489_v56, 16  ;;  %v499_v25 = vadd.s32 %v497_v23, %v491_v12  ;;  %v522_v27 = vshrl.u32 %v518_v52, 16  ;;  %v532_v28 = vadd.s32 %v530_v21, %v528_v19 }
 0x10d   : > { %v475_v22 = vadd.s32 %v474_v18, %v464_v8  ;;  %vm500_vm2 = vc.u32 %v498_v20, %v494_v13  ;;  %v495_v29 = vshrl.u32 %v490_v57, 16  ;;  %v524_v34 = vshrl.u32 %v519_v59, 16 }
 0x10e   : > { %v501_v26 = vsel %vm500_vm2, 1, %v1211_v4  ;;  %v533_v35 = vadd.s32 %v532_v28, %v522_v27 }
 0x10f   : > { %v476_v17 = vadd.s32 %v475_v22, %v466_v14  ;;  %v503_v30 = vadd.s32 %v501_v26, %v499_v25 }
 0x110   : > { %v534_v39 = vadd.s32 %v533_v35, %v524_v34 }
 0x111   : > { %v477_v31 = vshrl.u32 %v476_v17, 4  ;;  %v504_v32 = vadd.s32 %v503_v30, %v493_v24 }
 0x112   : > { %v535_v15 = vshrl.u32 %v534_v39, 4 }
 0x113   : > { %v478_v33 = vmul.u32 18, %v477_v31  ;;  %v505_v36 = vadd.s32 %v504_v32, %v495_v29 }
 0x114   : > { %v536_v47 = vmul.u32 18, %v535_v15 }
 0x115   : > { %v479_v37 = vsub.s32 %v450_v42, %v478_v33  ;;  %v506_v38 = vshrl.u32 %v505_v36, 4 }
 0x116   : > { %v537_v49 = vsub.s32 %v1360_v45, %v536_v47 }
 0x117   : > { %vm540_vm13 = vcmp.ne.s32.totalorder %v479_v37, 0  ;;  %vm543_vm1 = vcmp.lt.s32.totalorder %v479_v37, 0  ;;  %v507_v40 = vmul.u32 18, %v506_v38  ;;  %v549_v41 = vadd.s32 18, %v479_v37 }
 0x118   : > { %vm546_vm3 = vmand %vm543_vm1, %vm540_vm13  ;;  %v551_v50 = vadd.s32 18, %v537_v49 }
 0x119   : > { %v508_v16 = vsub.s32 %v1358_v43, %v507_v40  ;;  %v1373_v44 = vsel %vm546_vm3, %v549_v41, %v479_v37  ;;  %vm542_vm3 = vcmp.ne.s32.totalorder %v537_v49, 0  ;;  %v690_v43 = vunpack.c.h.b16 %v1211_v4 }
 0x11a   : > { %vm671_vm15 = vcmp.eq.s32.totalorder %v1373_v44, 17  ;;  %vm668_vm11 = vcmp.eq.s32.totalorder %v1373_v44, 0 }
 0x11b   : > { %vm541_vm4 = vcmp.ne.s32.totalorder %v508_v16, 0  ;;  %vm544_vm2 = vcmp.lt.s32.totalorder %v508_v16, 0  ;;  %v550_v46 = vadd.s32 18, %v508_v16 }
 0x11c   : > { %vm547_vm12 = vmand %vm544_vm2, %vm541_vm4  ;;  %vm545_vm4 = vcmp.lt.s32.totalorder %v537_v49, 0 }
 0x11d   : > { %v1377_v42 = vsel %vm547_vm12, %v550_v46, %v508_v16  ;;  %vm548_vm2 = vmand %vm545_vm4, %vm542_vm3 }
 0x11e   : > { %vm669_vm9 = vcmp.eq.s32.totalorder %v1377_v42, 0  ;;  %vm672_vm13 = vcmp.eq.s32.totalorder %v1377_v42, 17  ;;  %v1390_v51 = vsel %vm548_vm2, %v551_v50, %v537_v49 }
 0x11f   : > { %vm1381_vm1 = vmpackc.low %vm672_vm13, %vm671_vm15  ;;  %vm1569_vm12 = vcmp.lt.s32.totalorder %v1390_v51, 16  ;;  %vm1570_vm15 = vcmp.lt.s32.totalorder %v1373_v44, 16  ;;  %vm673_vm2 = vcmp.eq.s32.totalorder %v1390_v51, 17 }
 0x120   : > { %vm1385_vm7 = vmpackc.low %vm669_vm9, %vm668_vm11  ;;  %vm1568_vm9 = vcmp.lt.s32.totalorder %v1377_v42, 16  ;;  %vm1567_vm11 = vcmask 257024  }
 0x180   : > { %v445_v52 = vpop.f32.mrf.mxu2 }
 0x181   : > { %v566_v53 = vsel %vm1569_vm12, %v445_v52, 0.0  ;;  %vm659_vm12 = vcmask 23552  }
 0x182   : > { %v578_v54 = vmul.f32 %v566_v53, %v566_v53  ;;  %v571_v58 = vsel %vm1567_vm11, %v566_v53, 0.0  ;;  %v682_v53 = vsel %vm1381_vm1, 65537, %v1211_v4 }
 0x184   : > { %v419_v55 = vpop.f32.mrf.mxu0  ;;  %v432_v45 = vpop.f32.mrf.mxu1  ;;  %v582_v3 = vsel %vm1567_vm11, %v578_v54, 0.0  ;;  %v685_v54 = vperm.slane %v682_v53, 4 }
 0x185   : > { %v564_v56 = vsel %vm1570_vm15, %v419_v55, 0.0  ;;  %v565_v57 = vsel %vm1568_vm9, %v432_v45, 0.0  ;;  %vm643_vm9 = vcmask 7168  }
 0x186   : > { %v567_v59 = vsel %vm202_vm5, %v564_v56, 0.0  ;;  %v576_v60 = vmul.f32 %v564_v56, %v564_v56  ;;  %v568_v61 = vsel %vm202_vm5, %v565_v57, 0.0  ;;  %v577_v62 = vmul.f32 %v565_v57, %v565_v57 }
 0x187   : > { %v569_v63 = vadd.f32 %v568_v61, %v567_v59  ;;  %v694_v56 = vunpack.c.l.b16 %v685_v54  ;;  %v695_v57 = vunpack.c.h.b16 %v685_v54  ;;  %v689_v61 = vunpack.c.l.b16 %v1211_v4 }
 0x188   : > { %v447_v0 = vpop.f32.mrf.mxu2  ;;  %v579_v1 = vsel %vm202_vm5, %v576_v60, 0.0  ;;  %v580_v2 = vsel %vm202_vm5, %v577_v62, 0.0 }
 0x189   : > { %v572_v5 = vadd.f32 %v571_v58, %v569_v63  ;;  %v581_v6 = vadd.f32 %v580_v2, %v579_v1  ;;  %vm699_vm1 = vcmp.ne.s32.totalorder %v695_v57, %v690_v43 }
 0x18b   : > { %573 = vadd.xlane.f32.xlu0 %v572_v5  ;;  %v583_v7 = vadd.f32 %v582_v3, %v581_v6 }
 0x18c   : > { %v421_v8 = vpop.f32.mrf.mxu0  ;;  %v434_v9 = vpop.f32.mrf.mxu1 }
 0x18d   : > { %584 = vadd.xlane.f32.xlu1 %v583_v7 }
 0x1fe   : > { %v574_v10 = vpop.xlane.xlu0 %573 }
 0x1ff   : > { %v587_v12 = vmul.f32 0.00390625, %v574_v10 }
 0x200   : > { %v585_v13 = vpop.xlane.xlu1 %584 }
 0x201   : > { %v588_v14 = vmul.f32 0.00390625, %v585_v13  ;;  %v589_v18 = vmul.f32 %v587_v12, %v587_v12  ;;  %v603_v27 = vsub.f32 %v419_v55, %v587_v12  ;;  %v604_v28 = vsub.f32 %v432_v45, %v587_v12 }
 0x202   : > { %v605_v29 = vsub.f32 %v445_v52, %v587_v12  ;;  %v719_v52 = vsel %vm1385_vm7, 65537, %v1211_v4  ;;  %vm698_vm7 = vcmp.ne.s32.totalorder %v694_v56, %v689_v61  ;;  %v684_v12 = vperm.slane %v682_v53, 0 }
 0x203   : > { %v590_v19 = vsub.f32 %v588_v14, %v589_v18  ;;  %v722_v55 = vperm.slane %v719_v52, 4  ;;  %v721_v14 = vperm.slane %v719_v52, 0 }
 0x204   : > { %v687_v18 = vunpack.c.l.b16 %v684_v12 }
 0x205   : > { %v591_v20 = vmax.f32 %v590_v19, 0.0  ;;  %v731_v59 = vunpack.c.l.b16 %v722_v55  ;;  %v732_v48 = vunpack.c.h.b16 %v722_v55  ;;  %v688_v19 = vunpack.c.h.b16 %v684_v12 }
 0x207   : > { %v592_v21 = vadd.f32 1e-05, %v591_v20  ;;  %vm735_vm11 = vcmp.ne.s32.totalorder %v731_v59, %v689_v61 }
 0x209   : > { %1191 = vrsqrt.f32 %v592_v21  ;;  %vm599_vm3 = vweird.f32 %v592_v21 }
 0x20f   : > { %v1192_v22 = vpop.eup %1191 }
 0x210   : > { %v594_v23 = vmul.f32 %v1192_v22, %v592_v21  ;;  %vm600_vm13 = vweird.f32 %v1192_v22  ;;  %v724_v21 = vunpack.c.l.b16 %v721_v14 }
 0x211   : > { %vm601_vm4 = vmor %vm599_vm3, %vm600_vm13  ;;  %vm670_vm13 = vcmp.eq.s32.totalorder %v1390_v51, 0 }
 0x212   : > { %v595_v24 = vmul.f32 %v1192_v22, %v594_v23  ;;  %vm681_vm3 = vmpackc.low %vm673_vm2, %vm673_vm2  ;;  %vm736_vm2 = vcmp.ne.s32.totalorder %v732_v48, %v690_v43 }
 0x213   : > { %v683_v58 = vsel %vm681_vm3, 65537, %v1211_v4  ;;  %vm737_vm3 = vmpackc.low %vm736_vm2, %vm735_vm11  ;;  %vm632_vm2 = vcmask 252928  }
 0x214   : > { %v596_v25 = vmul.f32 0.5, %v595_v24  ;;  %v686_v62 = vperm.slane %v683_v58, 0 }
 0x216   : > { %v597_v17 = vsub.f32 1.5, %v596_v25  ;;  %v701_v3 = vunpack.c.l.b16 %v686_v62  ;;  %v702_v5 = vunpack.c.h.b16 %v686_v62 }
 0x218   : > { %v598_v26 = vmul.f32 %v1192_v22, %v597_v17 }
 0x21a   : > { %v602_v30 = vsel %vm601_vm4, %v1192_v22, %v598_v26  ;;  %vm718_vm4 = vmpackc.low %vm670_vm13, %vm670_vm13  ;;  %v725_v22 = vunpack.c.h.b16 %v721_v14 }
 0x21b   : > { %v608_v31 = vmul.f32 %v605_v29, %v602_v30  ;;  %v606_v32 = vmul.f32 %v603_v27, %v602_v30  ;;  %v607_v33 = vmul.f32 %v604_v28, %v602_v30  ;;  %v720_v60 = vsel %vm718_vm4, 65537, %v1211_v4  ;;  %vm700_vm13 = vmpackc.low %vm699_vm1, %vm698_vm7 }
 0x21c   : > { %v723_v63 = vperm.slane %v720_v60, 0  ;;  %vm705_vm4 = vcmp.ne.s32.totalorder %v701_v3, %v689_v61  ;;  %vm706_vm7 = vcmp.ne.s32.totalorder %v702_v5, %v690_v43 }
 0x21d   : > { %v611_v34 = vmax.f32 %v608_v31, 0.0  ;;  %v609_v35 = vmax.f32 %v606_v32, 0.0  ;;  %v610_v36 = vmax.f32 %v607_v33, 0.0  ;;  %vm707_vm15 = vmpackc.low %vm706_vm7, %vm705_vm4  ;;  %vm728_vm4 = vcmp.ne.s32.totalorder %v724_v21, %v689_v61 }
 0x21e   : > { %v738_v7 = vunpack.c.l.b16 %v723_v63  ;;  %v739_v8 = vunpack.c.h.b16 %v723_v63  ;;  %vm729_vm7 = vcmp.ne.s32.totalorder %v725_v22, %v690_v43 }
 0x21f   : > { %v1407_v37 = vpack.c.bf16 %v611_v34, %v611_v34  ;;  %v1409_v38 = vpack.c.bf16 %v610_v36, %v609_v35 }
 0x220   : > { %vm742_vm11 = vcmp.ne.s32.totalorder %v738_v7, %v689_v61  ;;  %vm743_vm1 = vcmp.ne.s32.totalorder %v739_v8, %v690_v43 }
 0x221   : > { %v618_v39 = vunpack.c.l.b16 %v1407_v37  ;;  %v617_v40 = vunpack.c.h.b16 %v1409_v38  ;;  %v616_v41 = vunpack.c.l.b16 %v1409_v38  ;;  %vm744_vm10 = vmpackc.low %vm743_vm1, %vm742_vm11 }
 0x222   : > { %vm730_vm1 = vmpackc.low %vm729_vm7, %vm728_vm4  ;;  %vm1582_vm4 = vcmask 1031168   ;;  %vm1583_vm7 = vcmask 1045504  }
 0x223   : > { %v621_v16 = vpack.c.b16 %v618_v39, %v618_v39  ;;  %v620_v15 = vpack.c.b16 %v617_v40, %v617_v40  ;;  %v619_v46 = vpack.c.b16 %v616_v41, %v616_v41 }
 0x225   : > { %626 = vrot.lane.b32.xlu1 %v621_v16, %s1203_s18  ;;  %624 = vrot.lane.b32.xlu0 %v620_v15, %s1203_s18 }
 0x226   : > { %637 = vrot.lane.b32.xlu2 %v619_v46, %s1212_s28 }
 0x22e   : > { %639 = vrot.lane.b32.xlu2 %v620_v15, %s1212_s28 }
 0x236   : > { %641 = vrot.lane.b32.xlu2 %v621_v16, %s1212_s28 }
 0x23e   : > { %653 = vrot.lane.b32.xlu2 %v619_v46, %s1213_s29 }
 0x246   : > { %655 = vrot.lane.b32.xlu2 %v620_v15, %s1213_s29 }
 0x24e   : > { %657 = vrot.lane.b32.xlu2 %v621_v16, %s1213_s29 }
 0x256   : > { %622 = vrot.lane.b32.xlu2 %v619_v46, %s1203_s18 }
 0x280   : > { %v1417_v47 = vpop.permute.xlu2 %637 }
 0x281   : > { %v651_v28 = vsel %vm643_vm9, %v1409_v38, %v1417_v47 }
 0x288   : > { %v640_v49 = vpop.permute.xlu2 %639 }
 0x289   : > { %v644_v6 = vsel %vm643_vm9, %v1417_v47, %v640_v49 }
 0x290   : > { %v642_v50 = vpop.permute.xlu2 %641 }
 0x291   : > { %v645_v23 = vsel %vm643_vm9, %v640_v49, %v642_v50  ;;  %vm778_vm9 = vcmask 556032  }
 0x297   : > { %v627_v0 = vpop.permute.xlu1 %626  ;;  %v625_v1 = vpop.permute.xlu0 %624 }
 0x298   : > { %v654_v45 = vpop.permute.xlu2 %653  ;;  %v629_v9 = vsel %vm231_vm14, %v625_v1, %v627_v0  ;;  %v635_v25 = vsel %vm632_vm2, %v627_v0, %v1407_v37  ;;  %vm1579_vm2 = vcmask 736256  }
 0x299   : > { %v666_v27 = vsel %vm659_vm12, %v1409_v38, %v654_v45 }
 0x2a0   : > { %v656_v2 = vpop.permute.xlu2 %655 }
 0x2a1   : > { %v660_v4 = vsel %vm659_vm12, %v654_v45, %v656_v2 }
 0x2a2   : > { %v709_v10 = vsel %vm700_vm13, %v660_v4, %v644_v6  ;;  %vm691_vm13 = vcmp.ne.s32.totalorder %v687_v18, %v689_v61 }
 0x2a3   : > { %v746_v13 = vsel %vm737_vm3, %v629_v9, %v709_v10  ;;  %vm692_vm3 = vcmp.ne.s32.totalorder %v688_v19, %v690_v43 }
 0x2a4   : > { %755 = vrot.lane.b32.xlu2 %v746_v13, %s1214_s30  ;;  %vm693_vm11 = vmpackc.low %vm692_vm3, %vm691_vm13  ;;  %vm1580_vm13 = vcmask 752640   ;;  %vm1581_vm3 = vcmask 744448  }
 0x2a5   : > { %v708_v31 = vsel %vm693_vm11, %v666_v27, %v651_v28  ;;  %vm1584_vm11 = vcmask 900096  }
 0x2a8   : > { %v658_v20 = vpop.permute.xlu2 %657 }
 0x2a9   : > { %v661_v24 = vsel %vm659_vm12, %v656_v2, %v658_v20  ;;  %vm759_vm12 = vcmask 146432  }
 0x2aa   : > { %v710_v17 = vsel %vm707_vm15, %v661_v24, %v645_v23  ;;  %vm774_vm15 = vcmask 408576  }
 0x2ab   : > { %v747_v26 = vsel %vm744_vm10, %v635_v25, %v710_v17  ;;  %vm766_vm10 = vcmask 441344  }
 0x2ac   : > { %762 = vrot.lane.b32.xlu2 %v746_v13, %s1215_s4  ;;  %764 = vrot.lane.b32.xlu1 %v747_v26, %s1215_s4 }
 0x2ad   : > { %757 = vrot.lane.b32.xlu0 %v747_v26, %s1214_s30 }
 0x2b0   : > { %v623_v29 = vpop.permute.xlu2 %622 }
 0x2b1   : > { %v628_v30 = vsel %vm231_vm14, %v623_v29, %v625_v1 }
 0x2b2   : > { %v745_v32 = vsel %vm730_vm1, %v628_v30, %v708_v31 }
 0x2b4   : > { %749 = vrot.lane.b32.xlu1 %v745_v32, %s1205_s20  ;;  %768 = vrot.lane.b32.xlu2 %v745_v32, %s1216_s5 }
 0x2b5   : > { %753 = vrot.lane.b32.xlu0 %v745_v32, %s1214_s30 }
 0x2fe   : > { %v756_v33 = vpop.permute.xlu2 %755 }
 0x306   : > { %v763_v34 = vpop.permute.xlu2 %762 }
 0x30e   : > { %v769_v40 = vpop.permute.xlu2 %768 }
 0x31e   : > { %v765_v35 = vpop.permute.xlu1 %764 }
 0x31f   : > { %v758_v36 = vpop.permute.xlu0 %757  ;;  %v767_v37 = vsel %vm766_vm10, %v763_v34, %v765_v35  ;;  %vm1586_vm10 = vmmov %vm1579_vm2 }
 0x320   : > { %v761_v38 = vsel %vm759_vm12, %v756_v33, %v758_v36 }
 0x321   : > { %v777_v39 = vsel %vm774_vm15, %v761_v38, %v767_v37  ;;  %vm1588_vm15 = vmmov %vm1583_vm7 }
 0x322   : > { %v780_v41 = vsel %vm778_vm9, %v777_v39, %v769_v40  ;;  %vm1590_vm9 = vmmov %vm1583_vm7 }
 0x323   : > { %v783_v49 = vrot.slane %v780_v41, 4 }
 0x326   : > { %v750_v16 = vpop.permute.xlu1 %749 }
 0x327   : > { %v754_v15 = vpop.permute.xlu0 %753 }
 0x328   : > { %v760_v46 = vsel %vm759_vm12, %v754_v15, %v756_v33  ;;  %v773_v50 = vsel %vm759_vm12, %v750_v16, %v754_v15  ;;  %vm1587_vm12 = vmmov %vm1580_vm13 }
 0x329   : > { %v782_v47 = vrot.slane %v760_v46, 6 }
 0x32b   : > { %v785_v52 = vsel %vm194_vm0, %v773_v50, %v782_v47 }
 0x32c   : > { %v787_v53 = vsel %vm202_vm5, %v785_v52, %v783_v49 }
 0x32d   : > { %789 = vst.msk [vmem:[#allocation2] sm:$0x3f] %vm1260_vm6, %v787_v53  ;;  %vm1578_vm6 = vcmask 891904  }
 0x32e   : > { %vm1585_vm1 = vmmov %vm1578_vm6 }
 0x334   : > { %v791_v54 = vld [vmem:[#allocation2] sm:$0x3f] }
 0x335   : > { %793 = vst [vmem:[#allocation1] ss:$4 sm:$0xff] %v791_v54 }
 0x33c   : > { %v1452_v55 = vld.sshfl [vmem:[#allocation1] sm:$0xff pattern:$0x73625140]  ;;  %v1454_v45 = vld.sshfl [vmem:[#allocation1 + $0x8] sm:$0xff pattern:$0x73625140] }
 0x33d   : > { %v1456_v56 = vld.sshfl [vmem:[#allocation1 + $0x10] sm:$0xff pattern:$0x73625140] }
 0x33e   : > { %798 = vst [vmem:[#allocation1 + $0x1] ss:$4 sm:$0xff] %v791_v54 }
 0x345   : > { %v801_v57 = vld.sshfl [vmem:[#allocation1 + $0x8] sm:$0xff pattern:$0x73625140]  ;;  %v803_v58 = vld.sshfl [vmem:[#allocation1 + $0x10] sm:$0xff pattern:$0x73625140] }
 0x346   : > { %807 = vrot.lane.b32.xlu1 %v801_v57, %s1203_s18  ;;  %v799_v59 = vld.sshfl [vmem:[#allocation1] sm:$0xff pattern:$0x73625140] }
 0x347   : > { %805 = vrot.lane.b32.xlu2 %v799_v59, %s1203_s18  ;;  %814 = vst [vmem:[#allocation1 + $0x2] ss:$4 sm:$0xff] %v791_v54 }
 0x34e   : > { %v819_v48 = vld.sshfl [vmem:[#allocation1 + $0x10] sm:$0xff pattern:$0x73625140]  ;;  %v817_v11 = vld.sshfl [vmem:[#allocation1 + $0x8] sm:$0xff pattern:$0x73625140] }
 0x34f   : > { %823 = vrot.lane.b32.xlu1 %v817_v11, %s1204_s19  ;;  %v815_v60 = vld.sshfl [vmem:[#allocation1] sm:$0xff pattern:$0x73625140] }
 0x350   : > { %821 = vrot.lane.b32.xlu2 %v815_v60, %s1204_s19  ;;  %830 = vst [vmem:[#allocation1 + $0x3] ss:$4 sm:$0xff] %v791_v54 }
 0x357   : > { %v835_v61 = vld.sshfl [vmem:[#allocation1 + $0x10] sm:$0xff pattern:$0x73625140]  ;;  %v833_v43 = vld.sshfl [vmem:[#allocation1 + $0x8] sm:$0xff pattern:$0x73625140] }
 0x358   : > { %839 = vrot.lane.b32.xlu2 %v833_v43, %s1205_s20  ;;  %v831_v62 = vld.sshfl [vmem:[#allocation1] sm:$0xff pattern:$0x73625140] }
 0x359   : > { %837 = vrot.lane.b32.xlu0 %v831_v62, %s1205_s20  ;;  %845 = vst [vmem:[#allocation1] ss:$4 sm:$0xff] %v791_v54 }
 0x360   : > { %v848_v63 = vld.sshfl [vmem:[#allocation1 + $0x8] sm:$0xff pattern:$0x73625140]  ;;  %v846_v0 = vld.sshfl [vmem:[#allocation1] sm:$0xff pattern:$0x73625140] }
 0x361   : > { %854 = vrot.lane.b32.xlu0 %v848_v63, %s1206_s21  ;;  %852 = vrot.lane.b32.xlu1 %v846_v0, %s1206_s21  ;;  %v850_v1 = vld.sshfl [vmem:[#allocation1 + $0x10] sm:$0xff pattern:$0x73625140]  ;;  %v790_v0 = vld [vmem:[%s1558_s2] sm:$0x3] }
 0x362   : > { %861 = vst [vmem:[#allocation1 + $0x1] ss:$4 sm:$0xff] %v791_v54 }
 0x369   : > { %856 = vrot.lane.b32.xlu1 %v850_v1, %s1206_s21  ;;  %v866_v2 = vld.sshfl [vmem:[#allocation1 + $0x10] sm:$0xff pattern:$0x73625140]  ;;  %v862_v3 = vld.sshfl [vmem:[#allocation1] sm:$0xff pattern:$0x73625140] }
 0x36a   : > { %872 = vrot.lane.b32.xlu0 %v866_v2, %s1207_s22  ;;  %868 = vrot.lane.b32.xlu2 %v862_v3, %s1207_s22  ;;  %v864_v5 = vld.sshfl [vmem:[#allocation1 + $0x8] sm:$0xff pattern:$0x73625140] }
 0x36b   : > { %877 = vst [vmem:[#allocation1 + $0x2] ss:$4 sm:$0xff] %v791_v54 }
 0x371   : > { %870 = vrot.lane.b32.xlu1 %v864_v5, %s1207_s22 }
 0x372   : > { %v882_v6 = vld.sshfl [vmem:[#allocation1 + $0x10] sm:$0xff pattern:$0x73625140]  ;;  %v880_v4 = vld.sshfl [vmem:[#allocation1 + $0x8] sm:$0xff pattern:$0x73625140] }
 0x373   : > { %886 = vrot.lane.b32.xlu2 %v880_v4, %s1208_s23  ;;  %v878_v7 = vld.sshfl [vmem:[#allocation1] sm:$0xff pattern:$0x73625140] }
 0x374   : > { %884 = vrot.lane.b32.xlu0 %v878_v7, %s1208_s23  ;;  %893 = vst [vmem:[#allocation1 + $0x3] ss:$4 sm:$0xff] %v791_v54 }
 0x37b   : > { %v896_v8 = vld.sshfl [vmem:[#allocation1 + $0x8] sm:$0xff pattern:$0x73625140]  ;;  %v894_v9 = vld.sshfl [vmem:[#allocation1] sm:$0xff pattern:$0x73625140] }
 0x37c   : > { %902 = vrot.lane.b32.xlu0 %v896_v8, %s1209_s24  ;;  %900 = vrot.lane.b32.xlu1 %v894_v9, %s1209_s24  ;;  %v898_v10 = vld.sshfl [vmem:[#allocation1 + $0x10] sm:$0xff pattern:$0x73625140] }
 0x37d   : > { %908 = vst [vmem:[#allocation1] ss:$4 sm:$0xff] %v791_v54 }
 0x384   : > { %904 = vrot.lane.b32.xlu1 %v898_v10, %s1209_s24  ;;  %v911_v12 = vld.sshfl [vmem:[#allocation1 + $0x8] sm:$0xff pattern:$0x73625140]  ;;  %v909_v13 = vld.sshfl [vmem:[#allocation1] sm:$0xff pattern:$0x73625140] }
 0x385   : > { %917 = vrot.lane.b32.xlu2 %v911_v12, %s1210_s25  ;;  %915 = vrot.lane.b32.xlu0 %v909_v13, %s1210_s25  ;;  %v913_v14 = vld.sshfl [vmem:[#allocation1 + $0x10] sm:$0xff pattern:$0x73625140] }
 0x38c   : > { %841 = vrot.lane.b32.xlu1 %v835_v61, %s1205_s20 }
 0x38d   : > { %888 = vrot.lane.b32.xlu2 %v882_v6, %s1208_s23  ;;  %919 = vrot.lane.b32.xlu0 %v913_v14, %s1210_s25 }
 0x395   : > { %825 = vrot.lane.b32.xlu2 %v819_v48, %s1204_s19  ;;  %809 = vrot.lane.b32.xlu0 %v803_v58, %s1203_s18 }
 0x3a1   : > { %v806_v19 = vpop.permute.xlu2 %805 }
 0x3aa   : > { %v822_v22 = vpop.permute.xlu2 %821 }
 0x3b2   : > { %v840_v25 = vpop.permute.xlu2 %839 }
 0x3b8   : > { %v808_v18 = vpop.permute.xlu1 %807 }
 0x3b9   : > { %v811_v16 = vsel %vm231_vm14, %v806_v19, %v808_v18 }
 0x3ba   : > { %v924_v54 = vsel %vm194_vm0, %v1452_v55, %v811_v16 }
 0x3c1   : > { %v824_v21 = vpop.permute.xlu1 %823 }
 0x3c2   : > { %v827_v47 = vsel %vm1582_vm4, %v822_v22, %v824_v21 }
 0x3c3   : > { %v930_v48 = vsel %vm202_vm5, %v924_v54, %v827_v47 }
 0x3c4   : > { %v869_v27 = vpop.permute.xlu2 %868 }
 0x3cb   : > { %v838_v20 = vpop.permute.xlu0 %837 }
 0x3cc   : > { %v843_v52 = vsel %vm1584_vm11, %v838_v20, %v840_v25 }
 0x3cd   : > { %v887_v30 = vpop.permute.xlu2 %886  ;;  %v936_v43 = vsel %vm1588_vm15, %v930_v48, %v843_v52 }
 0x3d3   : > { %v855_v23 = vpop.permute.xlu0 %854  ;;  %v853_v24 = vpop.permute.xlu1 %852 }
 0x3d4   : > { %v858_v36 = vsel %vm1578_vm6, %v853_v24, %v855_v23  ;;  %vm1591_vm6 = vcmask 293888  }
 0x3db   : > { %v857_v26 = vpop.permute.xlu1 %856 }
 0x3dc   : > { %v873_v17 = vpop.permute.xlu0 %872  ;;  %v859_v58 = vsel %vm1585_vm1, %v855_v23, %v857_v26  ;;  %vm1599_vm1 = vcmp.lt.s32.totalorder %v1373_v44, 16 }
 0x3dd   : > { %v952_v55 = vsel %vm194_vm0, %v857_v26, %v873_v17 }
 0x3df   : > { %v918_v32 = vpop.permute.xlu2 %917 }
 0x3e3   : > { %v871_v29 = vpop.permute.xlu1 %870 }
 0x3e4   : > { %v874_v34 = vsel %vm298_vm8, %v869_v27, %v871_v29  ;;  %v875_v53 = vsel %vm298_vm8, %v871_v29, %v873_v17  ;;  %vm1589_vm8 = vmmov %vm1581_vm3 }
 0x3e5   : > { %v946_v38 = vsel %vm194_vm0, %v858_v36, %v874_v34  ;;  %v949_v60 = vsel %vm194_vm0, %v859_v58, %v875_v53 }
 0x3e6   : > { %v885_v28 = vpop.permute.xlu0 %884 }
 0x3e7   : > { %v890_v39 = vsel %vm1580_vm13, %v885_v28, %v887_v30  ;;  %v889_v15 = vpop.permute.xlu2 %888  ;;  %vm1593_vm13 = vmmov %vm1582_vm4 }
 0x3e8   : > { %v954_v46 = vsel %vm202_vm5, %v946_v38, %v890_v39  ;;  %v891_v61 = vsel %vm1587_vm12, %v887_v30, %v889_v15  ;;  %v958_v1 = vsel %vm202_vm5, %v952_v55, %v889_v15  ;;  %vm1602_vm12 = vcmask 257024  }
 0x3e9   : > { %v956_v3 = vsel %vm202_vm5, %v949_v60, %v891_v61  ;;  %vm1603_vm15 = vmmov %vm1602_vm12 }
 0x3ee   : > { %v903_v31 = vpop.permute.xlu0 %902  ;;  %v901_v33 = vpop.permute.xlu1 %900 }
 0x3ef   : > { %v906_v41 = vsel %vm1581_vm3, %v901_v33, %v903_v31  ;;  %v826_v6 = vpop.permute.xlu2 %825  ;;  %vm1594_vm3 = vmmov %vm1584_vm11 }
 0x3f0   : > { %v960_v50 = vsel %vm1583_vm7, %v954_v46, %v906_v41  ;;  %v828_v10 = vsel %vm1593_vm13, %v824_v21, %v826_v6  ;;  %vm1598_vm11 = vmmov %vm1591_vm6 }
 0x3f1   : > { %vm1604_vm13 = vmmov %vm1602_vm12 }
 0x3f6   : > { %v905_v49 = vpop.permute.xlu1 %904 }
 0x3f7   : > { %v916_v35 = vpop.permute.xlu0 %915  ;;  %v907_v63 = vsel %vm1589_vm8, %v903_v31, %v905_v49  ;;  %v966_v2 = vsel %vm1590_vm9, %v958_v1, %v905_v49 }
 0x3f8   : > { %v921_v37 = vsel %vm1579_vm2, %v916_v35, %v918_v32  ;;  %vm1592_vm2 = vmmov %vm1583_vm7 }
 0x3f9   : > { %v972_v40 = vsel %vm194_vm0, %v921_v37, 0  ;;  %v963_v5 = vsel %vm1592_vm2, %v956_v3, %v907_v63  ;;  %vm1595_vm4 = vmmov %vm1592_vm2  ;;  %v1057_v63 = vld [vmem:[%s1254_s17] sm:$0xff] }
 0x3fa   : > { %985 = vmatpush.bf16.msra.mxu3 %v972_v40  ;;  %vm1596_vm7 = vmmov %vm1592_vm2  ;;  %vm1075_vm2 = vcmask 154624  }
 0x3fe   : > { %986 = vmatpush.bf16.msra.mxu3 %v960_v50  ;;  %v842_v4 = vpop.permute.xlu1 %841 }
 0x3ff   : > { %v920_v57 = vpop.permute.xlu0 %919  ;;  %v844_v14 = vsel %vm1594_vm3, %v840_v25, %v842_v4  ;;  %vm1605_vm3 = vcmask 891904  }
 0x400   : > { %v978_v59 = vsel %vm194_vm0, %v920_v57, 0  ;;  %v922_v11 = vsel %vm1586_vm10, %v918_v32, %v920_v57  ;;  %vm1601_vm10 = vcmp.lt.s32.totalorder %v1377_v42, 16 }
 0x401   : > { %1011 = vmatpush.bf16.msrb.mxu1 %v978_v59  ;;  %v975_v62 = vsel %vm194_vm0, %v922_v11, 0 }
 0x402   : > { %987 = vmatpush.bf16.msra.mxu3 %v936_v43  ;;  %998 = vmatpush.bf16.msrb.mxu0 %v975_v62 }
 0x405   : > { %1162 = vmatmul.msk.bf16.vlgmr.msra.gmra.mxu3 %vm1591_vm6, %v790_v0  ;;  %1012 = vmatpush.bf16.msrb.mxu1 %v966_v2 }
 0x406   : > { %999 = vmatpush.bf16.msrb.mxu0 %v963_v5  ;;  %v1058_v5 = vld [vmem:[%s1254_s17 + $0x8] sm:$0xf] }
 0x407   : > { %v810_v7 = vpop.permute.xlu0 %809 }
 0x408   : > { %v812_v8 = vsel %vm231_vm14, %v808_v18, %v810_v7  ;;  %v928_v9 = vsel %vm194_vm0, %v1456_v56, %v810_v7  ;;  %vm1597_vm14 = vmmov %vm1591_vm6 }
 0x409   : > { %v926_v12 = vsel %vm194_vm0, %v1454_v45, %v812_v8  ;;  %v934_v13 = vsel %vm202_vm5, %v928_v9, %v826_v6  ;;  %vm1600_vm0 = vcmp.lt.s32.totalorder %v1390_v51, 16 }
 0x40a   : > { %v942_v19 = vsel %vm1595_vm4, %v934_v13, %v842_v4  ;;  %v932_v20 = vsel %vm202_vm5, %v926_v12, %v828_v10 }
 0x40b   : > { %1013 = vmatpush.bf16.msrb.mxu1 %v942_v19  ;;  %v939_v22 = vsel %vm1596_vm7, %v932_v20, %v844_v14 }
 0x40c   : > { %1000 = vmatpush.bf16.msrb.mxu0 %v939_v22 }
 0x40e   : > { %1164 = vmatmul.msk.bf16.vlgmr.msrb.gmra.mxu1 %vm1597_vm14, %v790_v0 }
 0x40f   : > { %1163 = vmatmul.msk.bf16.vlgmr.msrb.gmra.mxu0 %vm1598_vm11, %v790_v0 }
 0x488   : > { %v989_v56 = vpop.f32.mrf.mxu3 }
 0x489   : > { %v1019_v45 = vsel %vm1599_vm1, %v989_v56, 0.0 }
 0x48a   : > { %v1030_v18 = vmul.f32 %v1019_v45, %v1019_v45  ;;  %v1022_v23 = vsel %vm202_vm5, %v1019_v45, 0.0 }
 0x48b   : > { %v1015_v21 = vpop.f32.mrf.mxu1 }
 0x48c   : > { %v1021_v24 = vsel %vm1600_vm0, %v1015_v21, 0.0  ;;  %v1002_v25 = vpop.f32.mrf.mxu0  ;;  %v1033_v44 = vsel %vm202_vm5, %v1030_v18, 0.0 }
 0x48d   : > { %v1032_v17 = vmul.f32 %v1021_v24, %v1021_v24  ;;  %v1020_v26 = vsel %vm1601_vm10, %v1002_v25, 0.0  ;;  %v1025_v29 = vsel %vm1602_vm12, %v1021_v24, 0.0 }
 0x48e   : > { %v1023_v27 = vsel %vm202_vm5, %v1020_v26, 0.0  ;;  %v1031_v28 = vmul.f32 %v1020_v26, %v1020_v26 }
 0x48f   : > { %v1024_v30 = vadd.f32 %v1023_v27, %v1022_v23  ;;  %v1036_v33 = vsel %vm1603_vm15, %v1032_v17, 0.0 }
 0x490   : > { %v991_v31 = vpop.f32.mrf.mxu3  ;;  %v1034_v32 = vsel %vm202_vm5, %v1031_v28, 0.0 }
 0x491   : > { %v1026_v51 = vadd.f32 %v1025_v29, %v1024_v30  ;;  %v1035_v34 = vadd.f32 %v1034_v32, %v1033_v44 }
 0x493   : > { %v1017_v35 = vpop.f32.mrf.mxu1  ;;  %1027 = vadd.xlane.f32.xlu0 %v1026_v51  ;;  %v1037_v36 = vadd.f32 %v1036_v33, %v1035_v34 }
 0x494   : > { %v1004_v42 = vpop.f32.mrf.mxu0 }
 0x495   : > { %1038 = vadd.xlane.f32.xlu2 %v1037_v36 }
 0x506   : > { %v1028_v37 = vpop.xlane.xlu0 %1027 }
 0x507   : > { %v1041_v38 = vmul.f32 0.00390625, %v1028_v37 }
 0x508   : > { %v1039_v39 = vpop.xlane.xlu2 %1038 }
 0x509   : > { %v1042_v40 = vmul.f32 0.00390625, %v1039_v39  ;;  %v1043_v41 = vmul.f32 %v1041_v38, %v1041_v38  ;;  %v1060_v57 = vsub.f32 %v1002_v25, %v1041_v38  ;;  %v1059_v59 = vsub.f32 %v989_v56, %v1041_v38 }
 0x50a   : > { %v1061_v43 = vsub.f32 %v1015_v21, %v1041_v38 }
 0x50b   : > { %v1044_v16 = vsub.f32 %v1042_v40, %v1043_v41 }
 0x50d   : > { %v1045_v15 = vmax.f32 %v1044_v16, 0.0 }
 0x50f   : > { %v1046_v46 = vadd.f32 1e-05, %v1045_v15 }
 0x511   : > { %1193 = vrsqrt.f32 %v1046_v46  ;;  %vm1053_vm9 = vweird.f32 %v1046_v46 }
 0x517   : > { %v1194_v47 = vpop.eup %1193 }
 0x518   : > { %v1048_v49 = vmul.f32 %v1194_v47, %v1046_v46  ;;  %vm1054_vm8 = vweird.f32 %v1194_v47 }
 0x519   : > { %vm1055_vm6 = vmor %vm1053_vm9, %vm1054_vm8 }
 0x51a   : > { %v1049_v50 = vmul.f32 %v1194_v47, %v1048_v49 }
 0x51c   : > { %v1050_v52 = vmul.f32 0.5, %v1049_v50 }
 0x51e   : > { %v1051_v53 = vsub.f32 1.5, %v1050_v52 }
 0x520   : > { %v1052_v54 = vmul.f32 %v1194_v47, %v1051_v53 }
 0x522   : > { %v1056_v58 = vsel %vm1055_vm6, %v1194_v47, %v1052_v54 }
 0x523   : > { %v1063_v48 = vmul.f32 %v1060_v57, %v1056_v58  ;;  %v1062_v11 = vmul.f32 %v1059_v59, %v1056_v58  ;;  %v1064_v62 = vmul.f32 %v1061_v43, %v1056_v58 }
 0x525   : > { %v1068_v60 = vrot.slane %v1063_v48, 4 }
 0x527   : > { %v1069_v61 = vsel %vm202_vm5, %v1062_v11, %v1068_v60 }
 0x528   : > { %1070 = vrot.lane.b32.xlu1 %v1069_v61, %s1217_s8 }
 0x530   : > { %1072 = vrot.lane.b32.xlu1 %v1064_v62, %s1217_s8 }
 0x59a   : > { %v1071_v55 = vpop.permute.xlu1 %1070 }
 0x59b   : > { %v1074_v0 = vrot.slane %v1071_v55, 4 }
 0x59d   : > { %v1076_v1 = vsel %vm1075_vm2, %v1074_v0, %v1071_v55 }
 0x59e   : > { %v1080_v2 = vadd.f32 %v1076_v1, %v1057_v63 }
 0x5a0   : > { %1084 = vrot.lane.b32.xlu1 %v1080_v2, %s1206_s21 }
 0x5a2   : > { %v1073_v3 = vpop.permute.xlu1 %1072 }
 0x5a3   : > { %v1077_v6 = vsel %vm1075_vm2, %v1074_v0, %v1073_v3 }
 0x5a4   : > { %v1081_v4 = vadd.f32 %v1077_v6, %v1058_v5 }
 0x5a8   : > { %1086 = vrot.lane.b32.xlu1 %v1081_v4, %s1206_s21 }
 0x612   : > { %v1085_v7 = vpop.permute.xlu1 %1084 }
 0x613   : > { %v1088_v9 = vrot.slane %v1085_v7, 4 }
 0x61a   : > { %v1087_v8 = vpop.permute.xlu1 %1086 }
 0x61b   : > { %v1089_v10 = vrot.slane %v1087_v8, 4  ;;  %1096 = vst.msk [vmem:[%s170_s11 + $0x8] sm:$0xf] %vm1604_vm13, %v1087_v8 }
 0x61d   : > { %v1090_v12 = vsel %vm202_vm5, %v1088_v9, %v1089_v10 }
 0x61e   : > { %v1092_v13 = vsel %vm1605_vm3, %v1085_v7, %v1090_v12 }
 0x61f   : > { %1095 = vst [vmem:[%s170_s11] sm:$0xff] %v1092_v13 }
 0x620 PF: > { %s13_s12 = sadd.s32 1, %s1201_s12  }
 0x621   : > { %p10_p4 = scmp.ge.s32.totalorder %s13_s12, 4  }
 0x623   :  { %12 = sbr.rel (!%p10_p4) target bundleno = 1 (0x1), region = 75 }

</bundles_post_ra>
